<compile_context>
chip_gen: v6e
topology: v6e:2x2x1
jax: 0.10.0
libtpu: 0.0.40
codegen_flags: <defaults>
</compile_context>

<pallas_src>
import functools

import jax
import jax.numpy as jnp
from jax.experimental import pallas as pl
from jax.experimental.pallas import tpu as pltpu


# --------------------------------------------------------------------------
# helpers
# --------------------------------------------------------------------------
def _round_up(x, m):
    return ((x + m - 1) // m) * m


def _pick_row_tile(ho, target=8):
    for cand in range(min(target, ho), 0, -1):
        if ho % cand == 0:
            return cand
    return 1


def _fold_bn(conv_bias, gamma, beta, mean, var, eps=1e-5):
    s = gamma / jnp.sqrt(var + eps)
    o = (conv_bias - mean) * s + beta
    return s, o


# --------------------------------------------------------------------------
# fused kernel: expand -> depthwise -> project, one (batch, row-tile) per step
# --------------------------------------------------------------------------
def _fused_bottleneck_kernel(xp_hbm, w1_ref, o1_ref, wd_ref, o2_ref, w3_ref,
                             o3_ref, out_ref, xbuf, copy_sem, *,
                             stride, add_residual):
    th, wo_pad, co = out_ref.shape[1], out_ref.shape[2], out_ref.shape[3]
    hin, wp, ci = xbuf.shape
    ce = w1_ref.shape[1]

    n = pl.program_id(0)
    r = pl.program_id(1)
    row0 = pl.multiple_of(r * (th * stride), th * stride)

    # Manually DMA the halo-overlapping row window of the (small, un-expanded,
    # already zero-padded) input into VMEM.
    # TODO(synk): could double-buffer this window DMA across grid steps; it is
    # tiny relative to the fused in-VMEM compute, so it is left synchronous.
    cp = pltpu.make_async_copy(xp_hbm.at[n, pl.ds(row0, hin)], xbuf, copy_sem)
    cp.start()
    cp.wait()
    x = xbuf[...]                                         # (hin, wp, ci) f32

    # ---- 1x1 expand + folded-BN offset + ReLU6 (MXU, bf16 in / f32 acc) ----
    y1 = jnp.dot(x.reshape(hin * wp, ci).astype(jnp.bfloat16), w1_ref[...],
                 preferred_element_type=jnp.float32)
    y1 = jnp.clip(y1 + o1_ref[...], 0.0, 6.0)
    exp = y1.reshape(hin, wp, ce)                         # expanded tile, VMEM only

    # ---- 3x3 depthwise (stride, pad baked into xp) + offset + ReLU6 (VPU) ----
    acc = jnp.zeros((th, wo_pad, ce), jnp.float32)
    if stride == 1:
        for ky in range(3):
            for kx in range(3):
                patch = jax.lax.slice(exp, (ky, kx, 0),
                                      (ky + th, kx + wo_pad, ce))
                acc = acc + patch * wd_ref[ky * 3 + kx]
    else:  # stride == 2: split even/odd columns ONCE so every tap is contiguous
        ev = jax.lax.slice(exp, (0, 0, 0),
                           (hin, stride * wo_pad + 1, ce), (1, stride, 1))
        od = jax.lax.slice(exp, (0, 1, 0),
                           (hin, stride * wo_pad + 1, ce), (1, stride, 1))
        col_src = {0: (ev, 0), 1: (od, 0), 2: (ev, 1)}
        for ky in range(3):
            for kx in range(3):
                src, c0 = col_src[kx]
                patch = jax.lax.slice(src, (ky, c0, 0),
                                      (ky + stride * (th - 1) + 1,
                                       c0 + wo_pad, ce),
                                      (stride, 1, 1))
                acc = acc + patch * wd_ref[ky * 3 + kx]
    y2 = jnp.clip(acc.reshape(th * wo_pad, ce) + o2_ref[...], 0.0, 6.0)

    # ---- 1x1 project + folded-BN offset (+ residual) (MXU) ----
    y3 = jnp.dot(y2.astype(jnp.bfloat16), w3_ref[...],
                 preferred_element_type=jnp.float32)
    y3 = y3 + o3_ref[...]
    if add_residual:
        res = jax.lax.slice(x, (1, 1, 0), (1 + th, 1 + wo_pad, ci))
        y3 = y3 + res.reshape(th * wo_pad, co)
    out_ref[0] = y3.reshape(th, wo_pad, co).astype(out_ref.dtype)


# --------------------------------------------------------------------------
# wrapper
# --------------------------------------------------------------------------
def linear_bottleneck_forward(x_nchw, params, *, in_channels, out_channels,
                              stride, t):
    assert stride in (1, 2)
    N, C, H, W = x_nchw.shape
    assert C == in_channels
    cexp = in_channels * t

    # lane-dense channel sizes
    CI = _round_up(in_channels, 128)
    CE = _round_up(cexp, 128)
    CO = _round_up(out_channels, 128)

    Ho = (H + 2 - 3) // stride + 1
    Wo = (W + 2 - 3) // stride + 1
    TH = _pick_row_tile(Ho)                      # output rows per grid step
    RT = Ho // TH
    HIN = (TH - 1) * stride + 3                  # input rows needed per tile
    WOP = _round_up(Wo, 8)                       # sublane-aligned output width
    WP = _round_up((WOP - 1) * stride + 3, 8)    # padded input width

    add_residual = (stride == 1 and in_channels == out_channels)

    # NCHW -> NHWC; pad 1-px conv halo plus extra zero cols/channels up to the
    # aligned sizes (the extra zeros never contribute to valid outputs).
    x = jnp.transpose(x_nchw, (0, 2, 3, 1)).astype(jnp.float32)
    xp = jnp.pad(x, ((0, 0), (1, 1), (1, WP - W - 1), (0, CI - in_channels)))

    # Fold BN scale into conv weights (host side, once); keep only offsets.
    s1, o1 = _fold_bn(params["b1"], *params["bn1"])
    s2, o2 = _fold_bn(params["bd"], *params["bn2"])
    s3, o3 = _fold_bn(params["b3"], *params["bn3"])

    w1 = jnp.pad(params["w1"] * s1[None, :],
                 ((0, CI - in_channels), (0, CE - cexp))).astype(jnp.bfloat16)
    wd = jnp.pad(params["wd"] * s2[None, None, :],
                 ((0, 0), (0, 0), (0, CE - cexp))).reshape(9, CE)   # f32 (VPU path)
    w3 = jnp.pad(params["w3"] * s3[None, :],
                 ((0, CE - cexp), (0, CO - out_channels))).astype(jnp.bfloat16)
    o1p = jnp.pad(o1, (0, CE - cexp)).reshape(1, CE)
    o2p = jnp.pad(o2, (0, CE - cexp)).reshape(1, CE)
    o3p = jnp.pad(o3, (0, CO - out_channels)).reshape(1, CO)

    kernel = functools.partial(_fused_bottleneck_kernel,
                               stride=stride, add_residual=add_residual)

    out_padded = pl.pallas_call(
        kernel,
        out_shape=jax.ShapeDtypeStruct((N, Ho, WOP, CO), jnp.float32),
        grid=(N, RT),
        in_specs=[
            pl.BlockSpec(memory_space=pl.ANY),               # padded input (HBM)
            pl.BlockSpec((CI, CE), lambda n, r: (0, 0)),     # expand weight (resident)
            pl.BlockSpec((1, CE), lambda n, r: (0, 0)),      # expand offset
            pl.BlockSpec((9, CE), lambda n, r: (0, 0)),      # depthwise weight
            pl.BlockSpec((1, CE), lambda n, r: (0, 0)),      # depthwise offset
            pl.BlockSpec((CE, CO), lambda n, r: (0, 0)),     # project weight
            pl.BlockSpec((1, CO), lambda n, r: (0, 0)),      # project offset
        ],
        out_specs=pl.BlockSpec((1, TH, WOP, CO), lambda n, r: (n, r, 0, 0)),
        scratch_shapes=[
            pltpu.VMEM((HIN, WP, CI), jnp.float32),          # input row window
            pltpu.SemaphoreType.DMA(()),
        ],
        compiler_params=pltpu.CompilerParams(
            dimension_semantics=("parallel", "parallel"),
            vmem_limit_bytes=32 * 1024 * 1024,
        ),
    )(xp, w1, o1p, wd, o2p, w3, o3p)

    out = out_padded[:, :, :Wo, :out_channels]
    return jnp.transpose(out, (0, 3, 1, 2))                  # NHWC -> NCHW


# --------------------------------------------------------------------------
# parameters + pure-JAX reference (for a sanity check)
# --------------------------------------------------------------------------
def init_params(key, in_channels, out_channels, t):
    cexp = in_channels * t
    ks = jax.random.split(key, 16)
    p = {}
    p["w1"] = 0.1 * jax.random.normal(ks[0], (in_channels, cexp), jnp.float32)
    p["b1"] = 0.01 * jax.random.normal(ks[1], (cexp,), jnp.float32)
    p["bn1"] = (1.0 + 0.1 * jax.random.normal(ks[2], (cexp,)),
                0.01 * jax.random.normal(ks[3], (cexp,)),
                0.01 * jax.random.normal(ks[4], (cexp,)),
                0.9 + 0.1 * jnp.abs(jax.random.normal(ks[5], (cexp,))))
    p["wd"] = 0.1 * jax.random.normal(ks[6], (3, 3, cexp), jnp.float32)
    p["bd"] = 0.01 * jax.random.normal(ks[7], (cexp,), jnp.float32)
    p["bn2"] = (1.0 + 0.1 * jax.random.normal(ks[8], (cexp,)),
                0.01 * jax.random.normal(ks[9], (cexp,)),
                0.01 * jax.random.normal(ks[10], (cexp,)),
                0.9 + 0.1 * jnp.abs(jax.random.normal(ks[11], (cexp,))))
    p["w3"] = 0.1 * jax.random.normal(ks[12], (cexp, out_channels), jnp.float32)
    p["b3"] = 0.01 * jax.random.normal(ks[13], (out_channels,), jnp.float32)
    p["bn3"] = (1.0 + 0.1 * jax.random.normal(ks[14], (out_channels,)),
                0.01 * jax.random.normal(ks[15], (out_channels,)),
                jnp.zeros((out_channels,), jnp.float32),
                jnp.ones((out_channels,), jnp.float32))
    return p


def _reference_forward(x_nchw, params, *, in_channels, out_channels, stride, t,
                       eps=1e-5):
    x = jnp.transpose(x_nchw, (0, 2, 3, 1)).astype(jnp.float32)
    N, H, W, _ = x.shape

    def bn(y, stats):
        g, b, m, v = stats
        return (y - m) / jnp.sqrt(v + eps) * g + b

    y = jnp.einsum("nhwc,ce->nhwe", x, params["w1"]) + params["b1"]
    y = jnp.clip(bn(y, params["bn1"]), 0.0, 6.0)

    yp = jnp.pad(y, ((0, 0), (1, 1), (1, 1), (0, 0)))
    Ho = (H + 2 - 3) // stride + 1
    Wo = (W + 2 - 3) // stride + 1
    acc = jnp.zeros((N, Ho, Wo, y.shape[-1]), jnp.float32)
    for ky in range(3):
        for kx in range(3):
            patch = yp[:, ky:ky + (Ho - 1) * stride + 1:stride,
                       kx:kx + (Wo - 1) * stride + 1:stride, :]
            acc = acc + patch * params["wd"][ky, kx]
    acc = jnp.clip(bn(acc + params["bd"], params["bn2"]), 0.0, 6.0)

    z = jnp.einsum("nhwc,co->nhwo", acc, params["w3"]) + params["b3"]
    z = bn(z, params["bn3"])
    if stride == 1 and in_channels == out_channels:
        z = z + x
    return jnp.transpose(z, (0, 3, 1, 2))


# --------------------------------------------------------------------------
if __name__ == "__main__":
    N, Cin, H, W = 2, 4, 16, 16
    Cout, stride, t = 4, 1, 6   # stride==1 and Cin==Cout -> residual add path

    key = jax.random.PRNGKey(0)
    k_x, k_p = jax.random.split(key)
    x = jax.random.normal(k_x, (N, Cin, H, W), jnp.float32)
    params = init_params(k_p, Cin, Cout, t)

    out = linear_bottleneck_forward(
        x, params, in_channels=Cin, out_channels=Cout, stride=stride, t=t)
    out = jax.block_until_ready(out)
    assert out.shape == (N, Cout, H, W), out.shape

    ref = _reference_forward(
        x, params, in_channels=Cin, out_channels=Cout, stride=stride, t=t)
    err = float(jnp.max(jnp.abs(out - ref)))
    assert err < 5e-2, f"max abs err {err}"
    print("KERNEL_OK")
</pallas_src>

<mosaic_0001>
module attributes {stable_mosaic.version = 11 : i64} {
  func.func @_fused_bottleneck_kernel(%arg0: i32, %arg1: i32, %arg2: memref<2x18x24x128xf32, #tpu.memory_space<any>>, %arg3: memref<128x128xbf16, #tpu.memory_space<vmem>>, %arg4: memref<1x128xf32, #tpu.memory_space<vmem>>, %arg5: memref<9x128xf32, #tpu.memory_space<vmem>>, %arg6: memref<1x128xf32, #tpu.memory_space<vmem>>, %arg7: memref<128x128xbf16, #tpu.memory_space<vmem>>, %arg8: memref<1x128xf32, #tpu.memory_space<vmem>>, %arg9: memref<1x8x16x128xf32, #tpu.memory_space<vmem>>, %arg10: memref<10x24x128xf32, #tpu.memory_space<vmem>>, %arg11: memref<!tpu.dma_semaphore, #tpu.memory_space<semaphore_mem>>) attributes {dimension_semantics = [#tpu.dimension_semantics<parallel>, #tpu.dimension_semantics<parallel>], iteration_bounds = array<i64: 2, 2>, scalar_prefetch = 0 : i64, scratch_operands = 2 : i64, tpu.core_type = #tpu.core_type<tc>, window_params = [{}, {pipeline_mode = #tpu.pipeline_mode<synchronous>, transform_indices = @transform_1, window_bounds = array<i64: 128, 128>}, {pipeline_mode = #tpu.pipeline_mode<synchronous>, transform_indices = @transform_2, window_bounds = array<i64: 1, 128>}, {pipeline_mode = #tpu.pipeline_mode<synchronous>, transform_indices = @transform_3, window_bounds = array<i64: 9, 128>}, {pipeline_mode = #tpu.pipeline_mode<synchronous>, transform_indices = @transform_4, window_bounds = array<i64: 1, 128>}, {pipeline_mode = #tpu.pipeline_mode<synchronous>, transform_indices = @transform_5, window_bounds = array<i64: 128, 128>}, {pipeline_mode = #tpu.pipeline_mode<synchronous>, transform_indices = @transform_6, window_bounds = array<i64: 1, 128>}, {transform_indices = @transform_7, window_bounds = array<i64: 1, 8, 16, 128>}]} {
    %c8_i32 = arith.constant 8 : i32
    %0 = arith.muli %arg1, %c8_i32 : i32
    %1 = tpu.assume_multiple %0, 8 : i32
    %c0_i32 = arith.constant 0 : i32
    %c0_i32_0 = arith.constant 0 : i32
    %2 = tpu.memref_slice %arg2[%arg0, %1, %c0_i32, %c0_i32_0] : memref<2x18x24x128xf32, #tpu.memory_space<any>> -> memref<1x10x24x128xf32, #tpu.memory_space<any>>
    %3 = tpu.memref_squeeze %2 : memref<1x10x24x128xf32, #tpu.memory_space<any>> -> memref<10x24x128xf32, #tpu.memory_space<any>>
    tpu.enqueue_dma source(%3 : memref<10x24x128xf32, #tpu.memory_space<any>>) target(%arg10 : memref<10x24x128xf32, #tpu.memory_space<vmem>>) target_semaphore(%arg11 : memref<!tpu.dma_semaphore, #tpu.memory_space<semaphore_mem>>)
    %c0_i32_1 = arith.constant 0 : i32
    %c0_i32_2 = arith.constant 0 : i32
    %4 = tpu.memref_slice %arg2[%arg0, %1, %c0_i32_1, %c0_i32_2] : memref<2x18x24x128xf32, #tpu.memory_space<any>> -> memref<1x10x24x128xf32, #tpu.memory_space<any>>
    %5 = tpu.memref_squeeze %4 : memref<1x10x24x128xf32, #tpu.memory_space<any>> -> memref<10x24x128xf32, #tpu.memory_space<any>>
    tpu.wait_dma2 semaphore(%arg11 : memref<!tpu.dma_semaphore, #tpu.memory_space<semaphore_mem>>) src(%5 : memref<10x24x128xf32, #tpu.memory_space<any>>) dst(%arg10 : memref<10x24x128xf32, #tpu.memory_space<vmem>>)
    %c0 = arith.constant 0 : index
    %c0_3 = arith.constant 0 : index
    %c0_4 = arith.constant 0 : index
    %6 = vector.load %arg10[%c0, %c0_3, %c0_4] : memref<10x24x128xf32, #tpu.memory_space<vmem>>, vector<10x24x128xf32>
    %7 = vector.shape_cast %6 : vector<10x24x128xf32> to vector<240x128xf32>
    %8 = arith.truncf %7 : vector<240x128xf32> to vector<240x128xbf16>
    %c0_5 = arith.constant 0 : index
    %c0_6 = arith.constant 0 : index
    %9 = vector.load %arg3[%c0_5, %c0_6] : memref<128x128xbf16, #tpu.memory_space<vmem>>, vector<128x128xbf16>
    %cst = arith.constant dense<0.000000e+00> : vector<240x128xf32>
    %10 = tpu.matmul %8, %9, %cst {dimension_numbers = #tpu.dot_dimension_numbers<[1], [0], [0], [1], [0, 0, 1, 1], [], []>} : vector<240x128xbf16>, vector<128x128xbf16>, vector<240x128xf32> -> vector<240x128xf32>
    %c0_7 = arith.constant 0 : index
    %c0_8 = arith.constant 0 : index
    %11 = vector.load %arg4[%c0_7, %c0_8] : memref<1x128xf32, #tpu.memory_space<vmem>>, vector<1x128xf32>
    %12 = vector.broadcast %11 : vector<1x128xf32> to vector<240x128xf32>
    %13 = arith.addf %10, %12 : vector<240x128xf32>
    %cst_9 = arith.constant 0.000000e+00 : f32
    %cst_10 = arith.constant 6.000000e+00 : f32
    %14 = vector.broadcast %cst_9 : f32 to vector<240x128xf32>
    %15 = arith.maximumf %14, %13 : vector<240x128xf32>
    %16 = vector.broadcast %cst_10 : f32 to vector<240x128xf32>
    %17 = arith.minimumf %16, %15 : vector<240x128xf32>
    %18 = vector.shape_cast %17 : vector<240x128xf32> to vector<10x24x128xf32>
    %cst_11 = arith.constant 0.000000e+00 : f32
    %19 = vector.broadcast %cst_11 : f32 to vector<8x16x128xf32>
    %20 = vector.extract_strided_slice %18 {offsets = [0, 0, 0], sizes = [8, 16, 128], strides = [1, 1, 1]} : vector<10x24x128xf32> to vector<8x16x128xf32>
    %c0_12 = arith.constant 0 : index
    %c0_13 = arith.constant 0 : index
    %21 = vector.load %arg5[%c0_12, %c0_13] : memref<9x128xf32, #tpu.memory_space<vmem>>, vector<1x128xf32>
    %22 = vector.shape_cast %21 : vector<1x128xf32> to vector<128xf32>
    %23 = vector.shape_cast %22 : vector<128xf32> to vector<1x1x128xf32>
    %24 = vector.broadcast %23 : vector<1x1x128xf32> to vector<8x16x128xf32>
    %25 = arith.mulf %20, %24 : vector<8x16x128xf32>
    %26 = arith.addf %19, %25 : vector<8x16x128xf32>
    %27 = vector.extract_strided_slice %18 {offsets = [0, 1, 0], sizes = [8, 16, 128], strides = [1, 1, 1]} : vector<10x24x128xf32> to vector<8x16x128xf32>
    %c1 = arith.constant 1 : index
    %c0_14 = arith.constant 0 : index
    %28 = vector.load %arg5[%c1, %c0_14] : memref<9x128xf32, #tpu.memory_space<vmem>>, vector<1x128xf32>
    %29 = vector.shape_cast %28 : vector<1x128xf32> to vector<128xf32>
    %30 = vector.shape_cast %29 : vector<128xf32> to vector<1x1x128xf32>
    %31 = vector.broadcast %30 : vector<1x1x128xf32> to vector<8x16x128xf32>
    %32 = arith.mulf %27, %31 : vector<8x16x128xf32>
    %33 = arith.addf %26, %32 : vector<8x16x128xf32>
    %34 = vector.extract_strided_slice %18 {offsets = [0, 2, 0], sizes = [8, 16, 128], strides = [1, 1, 1]} : vector<10x24x128xf32> to vector<8x16x128xf32>
    %c2 = arith.constant 2 : index
    %c0_15 = arith.constant 0 : index
    %35 = vector.load %arg5[%c2, %c0_15] : memref<9x128xf32, #tpu.memory_space<vmem>>, vector<1x128xf32>
    %36 = vector.shape_cast %35 : vector<1x128xf32> to vector<128xf32>
    %37 = vector.shape_cast %36 : vector<128xf32> to vector<1x1x128xf32>
    %38 = vector.broadcast %37 : vector<1x1x128xf32> to vector<8x16x128xf32>
    %39 = arith.mulf %34, %38 : vector<8x16x128xf32>
    %40 = arith.addf %33, %39 : vector<8x16x128xf32>
    %41 = vector.extract_strided_slice %18 {offsets = [1, 0, 0], sizes = [8, 16, 128], strides = [1, 1, 1]} : vector<10x24x128xf32> to vector<8x16x128xf32>
    %c3 = arith.constant 3 : index
    %c0_16 = arith.constant 0 : index
    %42 = vector.load %arg5[%c3, %c0_16] : memref<9x128xf32, #tpu.memory_space<vmem>>, vector<1x128xf32>
    %43 = vector.shape_cast %42 : vector<1x128xf32> to vector<128xf32>
    %44 = vector.shape_cast %43 : vector<128xf32> to vector<1x1x128xf32>
    %45 = vector.broadcast %44 : vector<1x1x128xf32> to vector<8x16x128xf32>
    %46 = arith.mulf %41, %45 : vector<8x16x128xf32>
    %47 = arith.addf %40, %46 : vector<8x16x128xf32>
    %48 = vector.extract_strided_slice %18 {offsets = [1, 1, 0], sizes = [8, 16, 128], strides = [1, 1, 1]} : vector<10x24x128xf32> to vector<8x16x128xf32>
    %c4 = arith.constant 4 : index
    %c0_17 = arith.constant 0 : index
    %49 = vector.load %arg5[%c4, %c0_17] : memref<9x128xf32, #tpu.memory_space<vmem>>, vector<1x128xf32>
    %50 = vector.shape_cast %49 : vector<1x128xf32> to vector<128xf32>
    %51 = vector.shape_cast %50 : vector<128xf32> to vector<1x1x128xf32>
    %52 = vector.broadcast %51 : vector<1x1x128xf32> to vector<8x16x128xf32>
    %53 = arith.mulf %48, %52 : vector<8x16x128xf32>
    %54 = arith.addf %47, %53 : vector<8x16x128xf32>
    %55 = vector.extract_strided_slice %18 {offsets = [1, 2, 0], sizes = [8, 16, 128], strides = [1, 1, 1]} : vector<10x24x128xf32> to vector<8x16x128xf32>
    %c5 = arith.constant 5 : index
    %c0_18 = arith.constant 0 : index
    %56 = vector.load %arg5[%c5, %c0_18] : memref<9x128xf32, #tpu.memory_space<vmem>>, vector<1x128xf32>
    %57 = vector.shape_cast %56 : vector<1x128xf32> to vector<128xf32>
    %58 = vector.shape_cast %57 : vector<128xf32> to vector<1x1x128xf32>
    %59 = vector.broadcast %58 : vector<1x1x128xf32> to vector<8x16x128xf32>
    %60 = arith.mulf %55, %59 : vector<8x16x128xf32>
    %61 = arith.addf %54, %60 : vector<8x16x128xf32>
    %62 = vector.extract_strided_slice %18 {offsets = [2, 0, 0], sizes = [8, 16, 128], strides = [1, 1, 1]} : vector<10x24x128xf32> to vector<8x16x128xf32>
    %c6 = arith.constant 6 : index
    %c0_19 = arith.constant 0 : index
    %63 = vector.load %arg5[%c6, %c0_19] : memref<9x128xf32, #tpu.memory_space<vmem>>, vector<1x128xf32>
    %64 = vector.shape_cast %63 : vector<1x128xf32> to vector<128xf32>
    %65 = vector.shape_cast %64 : vector<128xf32> to vector<1x1x128xf32>
    %66 = vector.broadcast %65 : vector<1x1x128xf32> to vector<8x16x128xf32>
    %67 = arith.mulf %62, %66 : vector<8x16x128xf32>
    %68 = arith.addf %61, %67 : vector<8x16x128xf32>
    %69 = vector.extract_strided_slice %18 {offsets = [2, 1, 0], sizes = [8, 16, 128], strides = [1, 1, 1]} : vector<10x24x128xf32> to vector<8x16x128xf32>
    %c7 = arith.constant 7 : index
    %c0_20 = arith.constant 0 : index
    %70 = vector.load %arg5[%c7, %c0_20] : memref<9x128xf32, #tpu.memory_space<vmem>>, vector<1x128xf32>
    %71 = vector.shape_cast %70 : vector<1x128xf32> to vector<128xf32>
    %72 = vector.shape_cast %71 : vector<128xf32> to vector<1x1x128xf32>
    %73 = vector.broadcast %72 : vector<1x1x128xf32> to vector<8x16x128xf32>
    %74 = arith.mulf %69, %73 : vector<8x16x128xf32>
    %75 = arith.addf %68, %74 : vector<8x16x128xf32>
    %76 = vector.extract_strided_slice %18 {offsets = [2, 2, 0], sizes = [8, 16, 128], strides = [1, 1, 1]} : vector<10x24x128xf32> to vector<8x16x128xf32>
    %c8 = arith.constant 8 : index
    %c0_21 = arith.constant 0 : index
    %77 = vector.load %arg5[%c8, %c0_21] : memref<9x128xf32, #tpu.memory_space<vmem>>, vector<1x128xf32>
    %78 = vector.shape_cast %77 : vector<1x128xf32> to vector<128xf32>
    %79 = vector.shape_cast %78 : vector<128xf32> to vector<1x1x128xf32>
    %80 = vector.broadcast %79 : vector<1x1x128xf32> to vector<8x16x128xf32>
    %81 = arith.mulf %76, %80 : vector<8x16x128xf32>
    %82 = arith.addf %75, %81 : vector<8x16x128xf32>
    %83 = vector.shape_cast %82 : vector<8x16x128xf32> to vector<128x128xf32>
    %c0_22 = arith.constant 0 : index
    %c0_23 = arith.constant 0 : index
    %84 = vector.load %arg6[%c0_22, %c0_23] : memref<1x128xf32, #tpu.memory_space<vmem>>, vector<1x128xf32>
    %85 = vector.broadcast %84 : vector<1x128xf32> to vector<128x128xf32>
    %86 = arith.addf %83, %85 : vector<128x128xf32>
    %cst_24 = arith.constant 0.000000e+00 : f32
    %cst_25 = arith.constant 6.000000e+00 : f32
    %87 = vector.broadcast %cst_24 : f32 to vector<128x128xf32>
    %88 = arith.maximumf %87, %86 : vector<128x128xf32>
    %89 = vector.broadcast %cst_25 : f32 to vector<128x128xf32>
    %90 = arith.minimumf %89, %88 : vector<128x128xf32>
    %91 = arith.truncf %90 : vector<128x128xf32> to vector<128x128xbf16>
    %c0_26 = arith.constant 0 : index
    %c0_27 = arith.constant 0 : index
    %92 = vector.load %arg7[%c0_26, %c0_27] : memref<128x128xbf16, #tpu.memory_space<vmem>>, vector<128x128xbf16>
    %cst_28 = arith.constant dense<0.000000e+00> : vector<128x128xf32>
    %93 = tpu.matmul %91, %92, %cst_28 {dimension_numbers = #tpu.dot_dimension_numbers<[1], [0], [0], [1], [0, 0, 1, 1], [], []>} : vector<128x128xbf16>, vector<128x128xbf16>, vector<128x128xf32> -> vector<128x128xf32>
    %c0_29 = arith.constant 0 : index
    %c0_30 = arith.constant 0 : index
    %94 = vector.load %arg8[%c0_29, %c0_30] : memref<1x128xf32, #tpu.memory_space<vmem>>, vector<1x128xf32>
    %95 = vector.broadcast %94 : vector<1x128xf32> to vector<128x128xf32>
    %96 = arith.addf %93, %95 : vector<128x128xf32>
    %97 = vector.extract_strided_slice %6 {offsets = [1, 1, 0], sizes = [8, 16, 128], strides = [1, 1, 1]} : vector<10x24x128xf32> to vector<8x16x128xf32>
    %98 = vector.shape_cast %97 : vector<8x16x128xf32> to vector<128x128xf32>
    %99 = arith.addf %96, %98 : vector<128x128xf32>
    %100 = vector.shape_cast %99 : vector<128x128xf32> to vector<8x16x128xf32>
    %c0_31 = arith.constant 0 : index
    %c0_32 = arith.constant 0 : index
    %c0_33 = arith.constant 0 : index
    %c0_34 = arith.constant 0 : index
    %101 = vector.load %arg9[%c0_31, %c0_32, %c0_33, %c0_34] : memref<1x8x16x128xf32, #tpu.memory_space<vmem>>, vector<1x8x16x128xf32>
    %102 = vector.shape_cast %101 : vector<1x8x16x128xf32> to vector<8x16x128xf32>
    %103 = vector.shape_cast %100 : vector<8x16x128xf32> to vector<1x8x16x128xf32>
    tpu.vector_store %arg9[%c0_31, %c0_32, %c0_33, %c0_34], %103 {strides = array<i32>} : memref<1x8x16x128xf32, #tpu.memory_space<vmem>>, vector<1x8x16x128xf32>,
    return
  }
  func.func @transform_1(%arg0: i32, %arg1: i32) -> (i32, i32) {
    %c0_i32 = arith.constant 0 : i32
    %c0_i32_0 = arith.constant 0 : i32
    %c0_i32_1 = arith.constant 0 : i32
    return %c0_i32, %c0_i32_0 : i32, i32
  }
  func.func @transform_2(%arg0: i32, %arg1: i32) -> (i32, i32) {
    %c0_i32 = arith.constant 0 : i32
    %c0_i32_0 = arith.constant 0 : i32
    %c0_i32_1 = arith.constant 0 : i32
    return %c0_i32, %c0_i32_0 : i32, i32
  }
  func.func @transform_3(%arg0: i32, %arg1: i32) -> (i32, i32) {
    %c0_i32 = arith.constant 0 : i32
    %c0_i32_0 = arith.constant 0 : i32
    %c0_i32_1 = arith.constant 0 : i32
    return %c0_i32, %c0_i32_0 : i32, i32
  }
  func.func @transform_4(%arg0: i32, %arg1: i32) -> (i32, i32) {
    %c0_i32 = arith.constant 0 : i32
    %c0_i32_0 = arith.constant 0 : i32
    %c0_i32_1 = arith.constant 0 : i32
    return %c0_i32, %c0_i32_0 : i32, i32
  }
  func.func @transform_5(%arg0: i32, %arg1: i32) -> (i32, i32) {
    %c0_i32 = arith.constant 0 : i32
    %c0_i32_0 = arith.constant 0 : i32
    %c0_i32_1 = arith.constant 0 : i32
    return %c0_i32, %c0_i32_0 : i32, i32
  }
  func.func @transform_6(%arg0: i32, %arg1: i32) -> (i32, i32) {
    %c0_i32 = arith.constant 0 : i32
    %c0_i32_0 = arith.constant 0 : i32
    %c0_i32_1 = arith.constant 0 : i32
    return %c0_i32, %c0_i32_0 : i32, i32
  }
  func.func @transform_7(%arg0: i32, %arg1: i32) -> (i32, i32, i32, i32) {
    %c0_i32 = arith.constant 0 : i32
    %c0_i32_0 = arith.constant 0 : i32
    %c0_i32_1 = arith.constant 0 : i32
    return %arg0, %arg1, %c0_i32, %c0_i32_0 : i32, i32, i32, i32
  }
}

</mosaic_0001>

<bundles_post_ra>
// kernel: tpu_custom_call.1
= control target key start
LH: loop header
LB: loop body
LE: loop exit
PB: predicated region body
PF: predicated region fallthrough
CT: control target
= control target key end

     0   :  { %s3804_s0 = inlined_call_operand.hbm [shape: f32[2,18,24,128], index: 0, kind: input, shape index: {}]   ;;  %s3805_s1 = inlined_call_operand.hbm [shape: bf16[128,128], index: 1, kind: input, shape index: {}]   ;;  %s3806_s2 = inlined_call_operand.vmem [shape: f32[1,128], index: 2, kind: input, shape index: {}]   ;;  %s3807_s3 = inlined_call_operand.hbm [shape: f32[9,128], index: 3, kind: input, shape index: {}]   ;;  %s3808_s4 = inlined_call_operand.vmem [shape: f32[1,128], index: 4, kind: input, shape index: {}]   ;;  %s3809_s5 = inlined_call_operand.hbm [shape: bf16[128,128], index: 5, kind: input, shape index: {}]   ;;  %s3810_s6 = inlined_call_operand.vmem [shape: f32[1,128], index: 6, kind: input, shape index: {}]   ;;  %s3811_s7 = inlined_call_operand.hbm [shape: f32[2,16,16,128], index: 7, kind: output, shape index: {}]  }
   0x1   :  { %3849 = sst [smem:[#allocation49_spill]] %s3805_s1 }
   0x2   :  { %3850 = sst [smem:[#allocation50_spill]] %s3807_s3 }
   0x3   :  { %3851 = sst [smem:[#allocation51_spill]] %s3809_s5 }
   0x4   :  { %12 = vsyncpa [#allocation5], 0 }
   0x5   :  { %13 = vsyncpa [#allocation8], 0 }
   0x6   :  { %14 = vsyncpa [#allocation6], 0 }
   0x7   :  { %16 = vsyncpa [#allocation6 + $0x1], 0  ;;  %s2595_s24 = smov 0   ;;  %s2597_s25 = smov 0  }
   0x8   :  { %s2599_s26 = smov 0   ;;  %s2601_s27 = smov 0  }
   0x9   :  { %s2603_s28 = smov 0   ;;  %s2605_s29 = smov 0  }
   0xa   :  { %s2607_s30 = smov 0   ;;  %s2609_s8 = smov 0  }
   0xb LB: > { %3852 = sst [smem:[#allocation19_spill]] %s2532_s29  ;;  %s1970_s9 = sadd.s32 4294967295, %s2540_s8   ;;  %s2540_s8 = sphi %s2609_s8, %s22_s8   ;;  %s2536_s30 = sphi %s2607_s30, %s3973_s30   ;;  %s2532_s29 = sphi %s2605_s29, %s3972_s29   ;;  %s2528_s28 = sphi %s2603_s28, %s3971_s28   ;;  %s2524_s27 = sphi %s2601_s27, %s3970_s27   ;;  %s2520_s26 = sphi %s2599_s26, %s3976_s26   ;;  %s2516_s25 = sphi %s2597_s25, %s3975_s25   ;;  %s2512_s24 = sphi %s2595_s24, %s3974_s24  }
   0xc   : > { %3853 = sst [smem:[#allocation20_spill]] %s2536_s30  ;;  %s1971_s10 = sadd.s32 4294967294, %s2540_s8  }
   0xd   : > { %s31_s11 = sadd.s32 1, %s2532_s29  ;;  %s34_s12 = sadd.s32 1, %s2536_s30 }
   0xe   : > { %p32_p0 = scmp.ge.s32.totalorder %s31_s11, 2  ;;  %s169_s13 = sadd.s32 1, %s2520_s26 }
   0xf   : > { %p179_p1 = scmp.ne.s32.totalorder %s2520_s26, %s2516_s25  ;;  %p180_p2 = scmp.eq.s32.totalorder %s1970_s9, 3 }
  0x10   : > { %s3978_s11 = smov (%p32_p0, %s31_s11), 0  ;;  %s3980_s12 = smov (!%p32_p0, %s34_s12), %s2536_s30 }
  0x11   : > { %3854 = sst [smem:[#allocation21_spill]] %s3978_s11  ;;  %s165_s14 = ssub.s32 %s2532_s29, %s3978_s11 }
  0x12   : > { %p2647_p3 = por %p180_p2, %p179_p1  ;;  %p36_p4 = scmp.ge.s32.totalorder %s3980_s12, 2 }
  0x13   : > { %p185_p5 = scmp.ne.s32.totalorder %s2516_s25, %s2512_s24  ;;  %p186_p6 = scmp.eq.s32.totalorder %s1971_s10, 3 }
  0x14   : > { %p1972_p7 = scmp.ge.s32.totalorder %s2540_s8, 1  ;;  %s3982_s12 = smov (%p36_p4, %s3980_s12), 0 }
  0x15   : > { %3856 = sst [smem:[#allocation22_spill]] %s3982_s12  ;;  %p2656_p8 = por %p186_p6, %p185_p5 }
  0x16   : > { %p193_p9 = scmp.lt.s32.totalorder %s2540_s8, 5  ;;  %s164_s17 = ssub.s32 %s2536_s30, %s3982_s12 }
  0x17   : > { %s166_s18 = sor.u32 %s165_s14, %s164_s17  ;;  %p2667_p12 = scmp.eq.s32.totalorder %s1970_s9, 0 }
  0x18   : > { %p2663_p10 = pnand %p1972_p7, %p193_p9  ;;  %p167_p11 = scmp.eq.s32.totalorder %s166_s18, 0 }
  0x19   : > { %s2542_s23 = smov [#allocation7]  }
  0x1a   : > { %p2198_p13 = pneg %p2663_p10  ;;  %s221_s10 = sshll.u32 %s2542_s23, 4  ;;  %s222_s10 = int_to_ptr.vmem [resolvable:$true] %s221_s10 }
  0x1b   : > { %s2674_s21 = scalar_select %p167_p11, %s2520_s26, %s169_s13  }
  0x1c   : > { %p2678_p0 = pnand %p2667_p12, %p2198_p13  ;;  %s2349_s9 = scalar_lea.vmem %s222_s10, 256 }
  0x1d   : > { %p2350_p2 = scmp.ne.s32.totalorder %s222_s10, %s2349_s9  ;;  %p2357_p6 = scmp.lt.s32.totalorder %s222_s10, %s222_s10 }
  0x1e   : > { %p2340_p1 = pneg %p2678_p0  ;;  %p2358_p7 = scmp.lt.s32.totalorder %s2349_s9, %s2349_s9 }
  0x20   : > { %p2352_p4 = pnand %p2350_p2, %p2340_p1  ;;  %p2359_p9 = por %p2358_p7, %p2357_p6 }
  0x22   : > { %p2353_p5 = pneg %p2352_p4 }
  0x24   : > { %p2360_p11 = pnand %p2359_p9, %p2353_p5 }
  0x26   : > { %2363 = shalt.err (!%p2360_p11)
}
  0x27   : > { %s2543_s13 = smov 128   ;;  %s2544_s14 = smov 8  }
  0x28   : > { %s3861_s3 = sld [smem:[#allocation50_spill]]  ;;  %s2545_s23 = smov [#allocation4]  }
  0x29   : > { %s205_s12 = sshll.u32 %s2545_s23, 4  ;;  %s206_s12 = int_to_ptr.vmem [resolvable:$true] %s205_s12 }
  0x2a   : > { %s2375_s11 = scalar_lea.vmem %s206_s12, 1024  ;;  %p2383_p5 = scmp.lt.s32.totalorder %s206_s12, %s206_s12 }
  0x2b   : > { %p2376_p13 = scmp.ne.s32.totalorder %s206_s12, %s2375_s11  ;;  %p2384_p6 = scmp.lt.s32.totalorder %s2375_s11, %s2375_s11 }
  0x2d   : > { %p2378_p2 = pnand %p2376_p13, %p2340_p1  ;;  %p2385_p7 = por %p2384_p6, %p2383_p5 }
  0x2e   : > { %2204 = dma.hbm_to_vmem [thread:$0]  (!%p2678_p0), %s3861_s3, 256, %s222_s10, [#allocation8], %s2543_s13, %s2543_s13, %s2544_s14  }
  0x2f   : > { %p2379_p4 = pneg %p2378_p2 }
  0x31   : > { %p2386_p9 = pnand %p2385_p7, %p2379_p4 }
  0x33   : > { %2389 = shalt.err (!%p2386_p9)
}
  0x34   : > { %s2546_s9 = smov 64   ;;  %s2547_s30 = smov 4  }
  0x35   : > { %s3862_s1 = sld [smem:[#allocation49_spill]]  ;;  %s2548_s14 = smov [#allocation9]  }
  0x36   : > { %s237_s17 = sshll.u32 %s2548_s14, 4  ;;  %s238_s17 = int_to_ptr.vmem [resolvable:$true] %s237_s17 }
  0x37   : > { %s2401_s18 = scalar_lea.vmem %s238_s17, 1024  ;;  %p2409_p4 = scmp.lt.s32.totalorder %s238_s17, %s238_s17 }
  0x38   : > { %p2402_p11 = scmp.ne.s32.totalorder %s238_s17, %s2401_s18  ;;  %p2410_p5 = scmp.lt.s32.totalorder %s2401_s18, %s2401_s18 }
  0x3a   : > { %p2404_p13 = pnand %p2402_p11, %p2340_p1  ;;  %p2411_p6 = por %p2410_p5, %p2409_p4 }
  0x3b   : > { %2201 = dma.hbm_to_vmem [thread:$0]  (!%p2678_p0), %s3862_s1, 1024, %s206_s12, [#allocation5], %s2546_s9, %s2546_s9, %s2547_s30  }
  0x3c   : > { %p2405_p2 = pneg %p2404_p13 }
  0x3e   : > { %p2412_p7 = pnand %p2411_p6, %p2405_p2 }
  0x40   : > { %2415 = shalt.err (!%p2412_p7)
}
  0x41   : > { %s3863_s5 = sld [smem:[#allocation51_spill]] }
  0x43   : > { %256 = sbr.rel (%p2663_p10) target bundleno = 743 (0x2e7), region = 44 }
  0x47   : > { %2207 = dma.hbm_to_vmem [thread:$0]  (!%p2678_p0), %s3863_s5, 1024, %s238_s17, [#allocation8], %s2546_s9, %s2546_s9, %s2547_s30  }
  0x48   : > { %2497 = dma.done.wait (%p2667_p12), [#allocation5], 1024  }
  0x49   : > { %2499 = vsyncadd (%p2667_p12), [#allocation5], 4294966272 }
  0x4a   : > { %2501 = dma.done.wait (%p2667_p12), [#allocation8], 1280  }
  0x4b   : > { %2503 = vsyncadd (%p2667_p12), [#allocation8], 4294966016  ;;  %s286_s30 = sand.u32 1, %s2516_s25   ;;  %s1982_s12 = smul.u32 192, %s2524_s27 }
  0x4c   : > { %s1980_s19 = sshll.u32 %s286_s30, 7  ;;  %s293_s22 = smul.u32 432, %s2528_s28 }
  0x4d   : > { %s2549_s10 = smov [#allocation2]   ;;  %s2418_s3 = scalar_lea.hbm %s3804_s0, 13824 }
  0x4e   : > { %s294_s9 = sadd.s32 %s1982_s12, %s293_s22  ;;  %s304_s13 = sshll.u32 %s2549_s10, 4  ;;  %s305_s13 = int_to_ptr.vmem [resolvable:$true] %s304_s13 }
  0x4f   : > { %s1983_s14 = sshll.u32 %s294_s9, 4 }
  0x50   : > { %s296_s11 = scalar_lea.hbm %s3804_s0, %s1983_s14 }
  0x51   : > { %s2416_s20 = scalar_lea.hbm %s296_s11, 3840  ;;  %p2419_p12 = scmp.lt.s32.totalorder %s296_s11, %s3804_s0 }
  0x52   : > { %p2417_p10 = scmp.ne.s32.totalorder %s296_s11, %s2416_s20  ;;  %p2420_p0 = scmp.lt.s32.totalorder %s2418_s3, %s2416_s20 }
  0x54   : > { %p2421_p1 = por %p2420_p0, %p2419_p12 }
  0x56   : > { %p2422_p9 = pnand %p2421_p1, %p2417_p10 }
  0x58   : > { %2425 = shalt.err (!%p2422_p9)  }
  0x59   : > { %s2426_s12 = scalar_lea.vmem %s305_s13, 3840  ;;  %p2431_p13 = scmp.lt.s32.totalorder %s305_s13, %s305_s13 }
  0x5a   : > { %p2427_p11 = scmp.ne.s32.totalorder %s305_s13, %s2426_s12  ;;  %p2432_p2 = scmp.lt.s32.totalorder %s2426_s12, %s2426_s12 }
  0x5c   : > { %p2433_p4 = por %p2432_p2, %p2431_p13 }
  0x5e   : > { %p2434_p5 = pnand %p2433_p4, %p2427_p11 }
  0x60   : > { %2437 = shalt.err (!%p2434_p5)  }
  0x61   : > { %307 = dma.hbm_to_vmem [thread:$0]  %s296_s11, 3840, %s305_s13, [#allocation3] }
  0x62   : > { %s2732_s22 = scalar_lea.vmem [#allocation10], %s1980_s19 }
  0x63   : > { %2504 = dma.done.wait [#allocation3], 3840 }
  0x64   : > { %2505 = vsyncadd [#allocation3], 4294963456  ;;  %v2550_v0 = vmov 0.0   ;;  %vm2551_vm0 = vmmov 0   ;;  %v2295_v1 = vld [vmem:[#allocation4 + $0x38] sm:$0xff]   ;;  %v2296_v2 = vld [vmem:[#allocation4 + $0x30] sm:$0xff]  }
  0x65   : > { %2060 = vmatprep.subr.bf16.mxu0 %v2550_v0  ;;  %2168 = vmatprep.subr.bf16.mxu1 %v2550_v0  ;;  %v2297_v3 = vld [vmem:[#allocation4 + $0x28] sm:$0xff]   ;;  %v2298_v4 = vld [vmem:[#allocation4 + $0x20] sm:$0xff]   ;;  %v2299_v5 = vld [vmem:[#allocation4 + $0x18] sm:$0xff]   ;;  %vm731_vm1 = vcmask 1046528   ;;  %vm857_vm2 = vcmask 1045504   ;;  %s2020_s10 = sshll.u32 %s2524_s27, 4 }
  0x66   : > { %2076 = vmatprep.mubr.msk.bf16.mxu0 %vm2551_vm0, %v2550_v0  ;;  %2116 = vmatprep.mubr.msk.bf16.mxu1 %vm2551_vm0, %v2550_v0  ;;  %v2300_v6 = vld [vmem:[#allocation4 + $0x10] sm:$0xff]   ;;  %v2301_v7 = vld [vmem:[#allocation4 + $0x8] sm:$0xff]   ;;  %v2302_v8 = vld [vmem:[#allocation4] sm:$0xff]   ;;  %s2015_s13 = sshll.u32 %s2528_s28, 5  ;;  %s1864_s17 = sshll.u32 %s2732_s22, 4  ;;  %s3741_s17 = int_to_ptr.vmem [resolvable:$true] %s1864_s17 }
  0x67   : > { %2061 = vmatpush3.bf16.msra.mxu0 %v2295_v1  ;;  %2176 = vmatpush3.bf16.msra.mxu1 %v2295_v1  ;;  %v312_v9 = vld [vmem:[#allocation2] sm:$0xff]  ;;  %v313_v10 = vld [vmem:[#allocation2 + $0x8] sm:$0xff]  ;;  %v314_v15 = vld [vmem:[#allocation2 + $0x10] sm:$0xff]  ;;  %s1861_s14 = sadd.s32 %s2020_s10, %s2015_s13  ;;  %s3753_s20 = scalar_lea.sflag [#allocation6], %s286_s30 }
  0x68   : > { %2062 = vmatprep.subr.bf16.mxu0 %v2550_v0  ;;  %2169 = vmatprep.subr.bf16.mxu1 %v2550_v0  ;;  %v332_v11 = vld [vmem:[#allocation2 + $0xa0] sm:$0xff]  ;;  %v333_v12 = vld [vmem:[#allocation2 + $0xa8] sm:$0xff]  ;;  %v342_v13 = vpack.c.bf16 %v313_v10, %v312_v9  ;;  %v2756_v16 = vld [vmem:[#allocation2 + $0x18] sm:$0xff]  ;;  %s2016_s27 = sshll.u32 %s1861_s14, 7  ;;  %s2438_s23 = scalar_lea.vmem %s3741_s17, 2048 }
  0x69   : > { %v352_v14 = vpack.c.bf16 %v333_v12, %v332_v11  ;;  %3864 = vst [vmem:[#allocation23_spill] sm:$0xff] %v2756_v16  ;;  %v334_v17 = vld [vmem:[#allocation2 + $0xb0] sm:$0xff]  ;;  %v335_v18 = vld [vmem:[#allocation2 + $0xb8] sm:$0xff]  ;;  %v343_v19 = vpack.c.bf16 %v2756_v16, %v314_v15  ;;  %v2761_v21 = vld [vmem:[#allocation2 + $0x20] sm:$0xff]  ;;  %s3748_s11 = scalar_lea.hbm %s3811_s7, %s2016_s27  ;;  %p2439_p6 = scmp.ne.s32.totalorder %s3741_s17, %s2438_s23 }
  0x6a   : > { %v353_v20 = vpack.c.bf16 %v335_v18, %v334_v17  ;;  %3865 = vst [vmem:[#allocation24_spill] sm:$0xff] %v2761_v21  ;;  %v2765_v22 = vld [vmem:[#allocation2 + $0x28] sm:$0xff]  ;;  %v336_v23 = vld [vmem:[#allocation2 + $0xc0] sm:$0xff]  ;;  %v2771_v27 = vld [vmem:[#allocation2 + $0x30] sm:$0xff]  ;;  %s2552_s12 = smov [#allocation10]  }
  0x6b   : > { %2063 = vmatpush3.bf16.msra.mxu0 %v2296_v2  ;;  %2177 = vmatpush3.bf16.msra.mxu1 %v2296_v2  ;;  %3866 = vst [vmem:[#allocation25_spill] sm:$0xff] %v2765_v22  ;;  %v337_v24 = vld [vmem:[#allocation2 + $0xc8] sm:$0xff]  ;;  %v344_v25 = vpack.c.bf16 %v2765_v22, %v2761_v21  ;;  %3867 = vst [vmem:[#allocation26_spill] sm:$0xff] %v2771_v27  ;;  %v2775_v28 = vld [vmem:[#allocation2 + $0x38] sm:$0xff]  ;;  %p2440_p7 = pnand %p2439_p6, %p2647_p3  ;;  %s2442_s1 = sshll.u32 %s2552_s12, 4  ;;  %s2443_s1 = int_to_ptr.vmem [resolvable:$false] %s2442_s1 }
  0x6c   : > { %2064 = vmatprep.subr.bf16.mxu0 %v2550_v0  ;;  %2170 = vmatprep.subr.bf16.mxu1 %v2550_v0  ;;  %v354_v26 = vpack.c.bf16 %v337_v24, %v336_v23  ;;  %3868 = vst [vmem:[#allocation27_spill] sm:$0xff] %v2775_v28  ;;  %v338_v29 = vld [vmem:[#allocation2 + $0xd0] sm:$0xff]  ;;  %v339_v30 = vld [vmem:[#allocation2 + $0xd8] sm:$0xff]  ;;  %v345_v31 = vpack.c.bf16 %v2775_v28, %v2771_v27  ;;  %v2781_v33 = vld [vmem:[#allocation2 + $0x40] sm:$0xff]  ;;  %s2444_s3 = scalar_lea.vmem %s2443_s1, 4096  ;;  %p2445_p12 = scmp.lt.s32.totalorder %s3741_s17, %s2443_s1 }
  0x6d   : > { %v355_v32 = vpack.c.bf16 %v339_v30, %v338_v29  ;;  %3869 = vst [vmem:[#allocation28_spill] sm:$0xff] %v2781_v33  ;;  %v321_v34 = vld [vmem:[#allocation2 + $0x48] sm:$0xff]  ;;  %v340_v35 = vld [vmem:[#allocation2 + $0xe0] sm:$0xff]  ;;  %v322_v39 = vld [vmem:[#allocation2 + $0x50] sm:$0xff]  ;;  %p2441_p10 = pneg %p2440_p7  ;;  %p2446_p0 = scmp.lt.s32.totalorder %s2444_s3, %s2438_s23 }
  0x6e   : > { %v341_v36 = vld [vmem:[#allocation2 + $0xe8] sm:$0xff]  ;;  %v346_v37 = vpack.c.bf16 %v321_v34, %v2781_v33  ;;  %v323_v40 = vld [vmem:[#allocation2 + $0x58] sm:$0xff]  ;;  %v324_v42 = vld [vmem:[#allocation2 + $0x60] sm:$0xff] }
  0x6f   : > { %2065 = vmatpush3.bf16.msra.mxu0 %v2297_v3  ;;  %2178 = vmatpush3.bf16.msra.mxu1 %v2297_v3  ;;  %v356_v38 = vpack.c.bf16 %v341_v36, %v340_v35  ;;  %v347_v41 = vpack.c.bf16 %v323_v40, %v322_v39  ;;  %v325_v43 = vld [vmem:[#allocation2 + $0x68] sm:$0xff]  ;;  %v326_v45 = vld [vmem:[#allocation2 + $0x70] sm:$0xff]  ;;  %v327_v46 = vld [vmem:[#allocation2 + $0x78] sm:$0xff]  ;;  %p2447_p1 = por %p2446_p0, %p2445_p12 }
  0x70   : > { %2066 = vmatprep.subr.bf16.mxu0 %v2550_v0  ;;  %2171 = vmatprep.subr.bf16.mxu1 %v2550_v0  ;;  %v348_v44 = vpack.c.bf16 %v325_v43, %v324_v42  ;;  %v349_v47 = vpack.c.bf16 %v327_v46, %v326_v45  ;;  %v328_v48 = vld [vmem:[#allocation2 + $0x80] sm:$0xff]  ;;  %v329_v49 = vld [vmem:[#allocation2 + $0x88] sm:$0xff]  ;;  %v330_v51 = vld [vmem:[#allocation2 + $0x90] sm:$0xff] }
  0x71   : > { %v350_v50 = vpack.c.bf16 %v329_v49, %v328_v48  ;;  %v331_v52 = vld [vmem:[#allocation2 + $0x98] sm:$0xff]  ;;  %v2304_v55 = vld [vmem:[#allocation9 + $0x30] sm:$0xff]   ;;  %v2305_v56 = vld [vmem:[#allocation9 + $0x28] sm:$0xff]   ;;  %p2448_p9 = pnand %p2447_p1, %p2441_p10 }
  0x72   : > { %v351_v53 = vpack.c.bf16 %v331_v52, %v330_v51  ;;  %v2303_v54 = vld [vmem:[#allocation9 + $0x38] sm:$0xff]   ;;  %v2306_v57 = vld [vmem:[#allocation9 + $0x20] sm:$0xff]   ;;  %v2308_v59 = vld [vmem:[#allocation9 + $0x10] sm:$0xff]  }
  0x73   : > { %2067 = vmatpush3.bf16.msra.mxu0 %v2298_v4  ;;  %2179 = vmatpush3.bf16.msra.mxu1 %v2298_v4  ;;  %v2307_v58 = vld [vmem:[#allocation9 + $0x18] sm:$0xff]   ;;  %v2309_v60 = vld [vmem:[#allocation9 + $0x8] sm:$0xff]   ;;  %v2310_v61 = vld [vmem:[#allocation9] sm:$0xff]  }
  0x74   : > { %2068 = vmatprep.subr.bf16.mxu0 %v2550_v0  ;;  %2172 = vmatprep.subr.bf16.mxu1 %v2550_v0  ;;  %v2801_v62 = vld [vmem:[%s3806_s2] ss:$0 sm:$0xff]  ;;  %v2809_v11 = vld [vmem:[#allocation7] ss:$0 sm:$0xff]  ;;  %v2811_v12 = vld [vmem:[#allocation7 + $0x1] ss:$0 sm:$0xff] }
  0x75   : > { %v2822_v34 = vld [vmem:[#allocation7 + $0x4] ss:$0 sm:$0xff]  ;;  %v2824_v35 = vld [vmem:[#allocation7 + $0x5] ss:$0 sm:$0xff] }
  0x77   : > { %2069 = vmatpush3.bf16.msra.mxu0 %v2299_v5  ;;  %2180 = vmatpush3.bf16.msra.mxu1 %v2299_v5 }
  0x78   : > { %2070 = vmatprep.subr.bf16.mxu0 %v2550_v0  ;;  %2173 = vmatprep.subr.bf16.mxu1 %v2550_v0 }
  0x7b   : > { %2071 = vmatpush3.bf16.msra.mxu0 %v2300_v6  ;;  %2181 = vmatpush3.bf16.msra.mxu1 %v2300_v6 }
  0x7c   : > { %2072 = vmatprep.subr.bf16.mxu0 %v2550_v0  ;;  %2174 = vmatprep.subr.bf16.mxu1 %v2550_v0 }
  0x7f   : > { %2073 = vmatpush3.bf16.msra.mxu0 %v2301_v7  ;;  %2182 = vmatpush3.bf16.msra.mxu1 %v2301_v7 }
  0x80   : > { %2074 = vmatprep.subr.bf16.mxu0 %v2550_v0  ;;  %2175 = vmatprep.subr.bf16.mxu1 %v2550_v0 }
  0x83   : > { %2075 = vmatpush3.bf16.msra.mxu0 %v2302_v8  ;;  %2183 = vmatpush3.bf16.msra.mxu1 %v2302_v8 }
  0x84   : > { %2136 = vmatprep.subr.bf16.mxu1 %v2303_v54 }
  0x86   : > { %2077 = vmatmul.mubr.bf16.vlgmr.msra.gmra.mxu0 %v342_v13  ;;  %2117 = vmatmul.mubr.bf16.vlgmr.msra.gmra.mxu1 %v352_v14  ;;  %v2813_v13 = vld [vmem:[#allocation7 + $0x2] ss:$0 sm:$0xff] }
  0x87   : > { %2080 = vmatprep.mubr.msk.bf16.mxu0 %vm2551_vm0, %v2550_v0  ;;  %2120 = vmatprep.mubr.msk.bf16.mxu1 %vm2551_vm0, %v2550_v0 }
  0x88   : > { %2137 = vmatpush3.bf16.msra.mxu1 %v2303_v54 }
  0x89   : > { %2138 = vmatprep.subr.bf16.mxu1 %v2304_v55 }
  0x8c   : > { %2139 = vmatpush3.bf16.msra.mxu1 %v2304_v55 }
  0x8d   : > { %2140 = vmatprep.subr.bf16.mxu1 %v2305_v56 }
  0x8e   : > { %2081 = vmatmul.mubr.bf16.gmra.mxu0 %v343_v19  ;;  %2121 = vmatmul.mubr.bf16.gmra.mxu1 %v353_v20 }
  0x8f   : > { %2084 = vmatprep.mubr.msk.bf16.mxu0 %vm2551_vm0, %v2550_v0  ;;  %2124 = vmatprep.mubr.msk.bf16.mxu1 %vm2551_vm0, %v2550_v0 }
  0x90   : > { %2141 = vmatpush3.bf16.msra.mxu1 %v2305_v56  ;;  %v2846_v56 = vld [vmem:[#allocation7 + $0x7] ss:$0 sm:$0xff] }
  0x91   : > { %2142 = vmatprep.subr.bf16.mxu1 %v2306_v57 }
  0x94   : > { %2143 = vmatpush3.bf16.msra.mxu1 %v2306_v57  ;;  %v2848_v57 = vld [vmem:[#allocation7 + $0x8] ss:$0 sm:$0xff] }
  0x95   : > { %2144 = vmatprep.subr.bf16.mxu1 %v2307_v58 }
  0x96   : > { %2085 = vmatmul.mubr.bf16.gmra.mxu0 %v344_v25  ;;  %2125 = vmatmul.mubr.bf16.gmra.mxu1 %v354_v26 }
  0x97   : > { %2088 = vmatprep.mubr.msk.bf16.mxu0 %vm2551_vm0, %v2550_v0  ;;  %2128 = vmatprep.mubr.msk.bf16.mxu1 %vm2551_vm0, %v2550_v0 }
  0x98   : > { %2145 = vmatpush3.bf16.msra.mxu1 %v2307_v58 }
  0x99   : > { %2146 = vmatprep.subr.bf16.mxu1 %v2308_v59 }
  0x9c   : > { %2147 = vmatpush3.bf16.msra.mxu1 %v2308_v59 }
  0x9d   : > { %2148 = vmatprep.subr.bf16.mxu1 %v2309_v60 }
  0x9e   : > { %2089 = vmatmul.mubr.bf16.gmra.mxu0 %v345_v31  ;;  %2129 = vmatmul.mubr.bf16.gmra.mxu1 %v355_v32 }
  0x9f   : > { %2092 = vmatprep.mubr.msk.bf16.mxu0 %vm2551_vm0, %v2550_v0  ;;  %2132 = vmatprep.mubr.msk.bf16.mxu1 %vm2551_vm0, %v2550_v0 }
  0xa0   : > { %2149 = vmatpush3.bf16.msra.mxu1 %v2309_v60 }
  0xa1   : > { %2150 = vmatprep.subr.bf16.mxu1 %v2310_v61 }
  0xa4   : > { %2151 = vmatpush3.bf16.msra.mxu1 %v2310_v61 }
  0xa6   : > { %2093 = vmatmul.mubr.bf16.gmra.mxu0 %v346_v37  ;;  %2133 = vmatmul.mubr.bf16.gmra.mxu1 %v356_v38 }
  0xa7   : > { %2096 = vmatprep.mubr.msk.bf16.mxu0 %vm2551_vm0, %v2550_v0 }
  0xae   : > { %2097 = vmatmul.mubr.bf16.gmra.mxu0 %v347_v41 }
  0xaf   : > { %2100 = vmatprep.mubr.msk.bf16.mxu0 %vm2551_vm0, %v2550_v0 }
  0xb6   : > { %2101 = vmatmul.mubr.bf16.gmra.mxu0 %v348_v44 }
  0xb7   : > { %2104 = vmatprep.mubr.msk.bf16.mxu0 %vm2551_vm0, %v2550_v0 }
  0xbe   : > { %2105 = vmatmul.mubr.bf16.gmra.mxu0 %v349_v47 }
  0xbf   : > { %2108 = vmatprep.mubr.msk.bf16.mxu0 %vm2551_vm0, %v2550_v0 }
  0xc6   : > { %2109 = vmatmul.mubr.bf16.gmra.mxu0 %v350_v50 }
  0xc7   : > { %2112 = vmatprep.mubr.msk.bf16.mxu0 %vm2551_vm0, %v2550_v0 }
  0xce   : > { %2113 = vmatmul.mubr.bf16.gmra.mxu0 %v351_v53 }
 0x146   : > { %v462_v63 = vpop.f32.mrf.mxu0  ;;  %v542_v0 = vpop.f32.mrf.mxu1 }
 0x147   : > { %v463_v1 = vadd.f32 %v2801_v62, %v462_v63  ;;  %v543_v2 = vadd.f32 %v2801_v62, %v542_v0 }
 0x148   : > { %v2078_v5 = vpop.f32.mrf.mxu0  ;;  %v2118_v6 = vpop.f32.mrf.mxu1 }
 0x149   : > { %v581_v9 = vmax.f32 %v463_v1, 0.0  ;;  %v601_v10 = vmax.f32 %v543_v2, 0.0 }
 0x14a   : > { %v465_v14 = vpop.f32.mrf.mxu0  ;;  %v545_v15 = vpop.f32.mrf.mxu1 }
 0x14b   : > { %v611_v18 = vmin.f32 %v581_v9, 6.0  ;;  %v466_v19 = vadd.f32 %v2801_v62, %v465_v14  ;;  %v631_v20 = vmin.f32 %v601_v10, 6.0  ;;  %v546_v25 = vadd.f32 %v2801_v62, %v545_v15 }
 0x14c   : > { %v2079_v24 = vpop.f32.mrf.mxu0  ;;  %v2119_v26 = vpop.f32.mrf.mxu1 }
 0x14d   : > { %v646_v29 = vmul.f32 %v2809_v11, %v611_v18  ;;  %v683_v30 = vmul.f32 %v2811_v12, %v611_v18  ;;  %v809_v31 = vmul.f32 %v2813_v13, %v611_v18  ;;  %v582_v32 = vmax.f32 %v466_v19, 0.0 }
 0x14e   : > { %v470_v36 = vpop.f32.mrf.mxu0  ;;  %v2827_v37 = vmul.f32 %v2811_v12, %v631_v20  ;;  %v2830_v38 = vmul.f32 %v2813_v13, %v631_v20  ;;  %v2833_v39 = vmul.f32 %v2822_v34, %v631_v20  ;;  %v2836_v40 = vmul.f32 %v2824_v35, %v631_v20  ;;  %v550_v41 = vpop.f32.mrf.mxu1 }
 0x14f   : > { %v732_v42 = vrot.slane %v683_v30, 1  ;;  %v858_v43 = vrot.slane %v809_v31, 2  ;;  %v612_v44 = vmin.f32 %v582_v32, 6.0  ;;  %v471_v45 = vadd.f32 %v2801_v62, %v470_v36 }
 0x150   : > { %3870 = vst [vmem:[#allocation29_spill] sm:$0xff] %v2827_v37  ;;  %3871 = vst [vmem:[#allocation30_spill] sm:$0xff] %v2830_v38  ;;  %v2082_v46 = vpop.f32.mrf.mxu0  ;;  %v2122_v51 = vpop.f32.mrf.mxu1  ;;  %v602_v59 = vmax.f32 %v546_v25, 0.0  ;;  %v551_v60 = vadd.f32 %v2801_v62, %v550_v41  ;;  %v2852_v63 = vmul.f32 %v2846_v56, %v631_v20  ;;  %v2855_v0 = vmul.f32 %v2848_v57, %v631_v20 }
 0x151   : > { %3872 = vst [vmem:[#allocation31_spill] sm:$0xff] %v2833_v39  ;;  %3873 = vst [vmem:[#allocation32_spill] sm:$0xff] %v2836_v40  ;;  %v647_v52 = vmul.f32 %v2809_v11, %v612_v44  ;;  %v684_v53 = vmul.f32 %v2811_v12, %v612_v44  ;;  %v810_v54 = vmul.f32 %v2813_v13, %v612_v44  ;;  %v583_v55 = vmax.f32 %v471_v45, 0.0 }
 0x152   : > { %v473_v58 = vpop.f32.mrf.mxu0  ;;  %v553_v61 = vpop.f32.mrf.mxu1  ;;  %3874 = vst [vmem:[#allocation33_spill] sm:$0xff] %v2852_v63  ;;  %3875 = vst [vmem:[#allocation34_spill] sm:$0xff] %v2855_v0  ;;  %v2858_v10 = vmin.f32 %v602_v59, 6.0  ;;  %v603_v14 = vmax.f32 %v551_v60, 0.0 }
 0x153   : > { %v733_v1 = vrot.slane %v684_v53, 1  ;;  %v859_v2 = vrot.slane %v810_v54, 2  ;;  %v613_v5 = vmin.f32 %v583_v55, 6.0  ;;  %v474_v6 = vadd.f32 %v2801_v62, %v473_v58  ;;  %v2874_v54 = vld [vmem:[#allocation7 + $0x3] ss:$0 sm:$0xff] }
 0x154   : > { %v2083_v9 = vpop.f32.mrf.mxu0  ;;  %3876 = vst [vmem:[#allocation35_spill] sm:$0xff] %v2858_v10  ;;  %v554_v15 = vadd.f32 %v2801_v62, %v553_v61  ;;  %v2123_v18 = vpop.f32.mrf.mxu1  ;;  %v2866_v36 = vmin.f32 %v603_v14, 6.0  ;;  %v2880_v59 = vmul.f32 %v2809_v11, %v2858_v10 }
 0x155   : > { %v734_v24 = vsel %vm731_vm1, %v732_v42, %v733_v1  ;;  %v860_v25 = vsel %vm857_vm2, %v858_v43, %v859_v2  ;;  %v685_v20 = vmul.f32 %v2811_v12, %v613_v5  ;;  %v811_v26 = vmul.f32 %v2813_v13, %v613_v5 }
 0x156   : > { %v788_v30 = vadd.f32 %v734_v24, %v646_v29  ;;  %v584_v31 = vmax.f32 %v474_v6, 0.0  ;;  %v478_v32 = vpop.f32.mrf.mxu0  ;;  %v604_v41 = vmax.f32 %v554_v15, 0.0  ;;  %v558_v44 = vpop.f32.mrf.mxu1 }
 0x157   : > { %v735_v45 = vrot.slane %v685_v20, 1  ;;  %v861_v46 = vrot.slane %v811_v26, 2  ;;  %v479_v51 = vadd.f32 %v2801_v62, %v478_v32  ;;  %v2870_v53 = vadd.f32 %v2801_v62, %v558_v44 }
 0x158   : > { %v2872_v42 = vadd.f32 %v860_v25, %v788_v30  ;;  %v614_v43 = vmin.f32 %v584_v31, 6.0  ;;  %v2086_v55 = vpop.f32.mrf.mxu0  ;;  %v2876_v29 = vmin.f32 %v604_v41, 6.0  ;;  %v2126_v58 = vpop.f32.mrf.mxu1 }
 0x159   : > { %v736_v60 = vsel %vm731_vm1, %v733_v1, %v735_v45  ;;  %v862_v61 = vsel %vm857_vm2, %v859_v2, %v861_v46  ;;  %v585_v5 = vmax.f32 %v479_v51, 0.0  ;;  %v605_v6 = vmax.f32 %v2870_v53, 0.0 }
 0x15a   : > { %3877 = vst [vmem:[#allocation36_spill] sm:$0xff] %v2876_v29  ;;  %v789_v9 = vadd.f32 %v736_v60, %v647_v52  ;;  %v648_v14 = vmul.f32 %v2809_v11, %v614_v43  ;;  %v686_v15 = vmul.f32 %v2811_v12, %v614_v43  ;;  %v812_v18 = vmul.f32 %v2813_v13, %v614_v43  ;;  %v481_v24 = vpop.f32.mrf.mxu0  ;;  %v2888_v25 = vpop.f32.mrf.mxu1 }
 0x15b   : > { %v2891_v20 = vmul.f32 %v2874_v54, %v614_v43  ;;  %v2894_v1 = vmul.f32 %v2822_v34, %v614_v43  ;;  %v2897_v2 = vmul.f32 %v2824_v35, %v614_v43  ;;  %v615_v26 = vmin.f32 %v585_v5, 6.0 }
 0x15c   : > { %v915_v52 = vadd.f32 %v862_v61, %v789_v9  ;;  %v737_v30 = vrot.slane %v686_v15, 1  ;;  %v863_v31 = vrot.slane %v812_v18, 2  ;;  %v482_v32 = vadd.f32 %v2801_v62, %v481_v24  ;;  %v2087_v41 = vpop.f32.mrf.mxu0  ;;  %v2127_v44 = vpop.f32.mrf.mxu1 }
 0x15d   : > { %v649_v51 = vmul.f32 %v2809_v11, %v615_v26  ;;  %v687_v55 = vmul.f32 %v2811_v12, %v615_v26  ;;  %v813_v43 = vmul.f32 %v2813_v13, %v615_v26  ;;  %v936_v60 = vmul.f32 %v2874_v54, %v615_v26 }
 0x15e   : > { %v586_v58 = vmax.f32 %v482_v32, 0.0  ;;  %v2907_v61 = vmul.f32 %v2822_v34, %v615_v26  ;;  %v486_v5 = vpop.f32.mrf.mxu0  ;;  %v566_v9 = vpop.f32.mrf.mxu1  ;;  %v2910_v18 = vmul.f32 %v2824_v35, %v615_v26  ;;  %v2915_v41 = vmul.f32 %v2811_v12, %v2876_v29 }
 0x15f   : > { %v738_v15 = vrot.slane %v687_v55, 1  ;;  %v487_v24 = vadd.f32 %v2801_v62, %v486_v5  ;;  %v864_v44 = vrot.slane %v813_v43, 2  ;;  %v952_v7 = vadd.f32 %v936_v60, %v915_v52 }
 0x160   : > { %v616_v32 = vmin.f32 %v586_v58, 6.0  ;;  %v3817_v23 = vrot.slane %v2907_v61, 1  ;;  %v2090_v3 = vpop.f32.mrf.mxu0  ;;  %v2130_v4 = vpop.f32.mrf.mxu1  ;;  %v3816_v55 = vrot.slane %v2910_v18, 2 }
 0x161   : > { %v739_v8 = vsel %vm731_vm1, %v737_v30, %v738_v15  ;;  %v587_v17 = vmax.f32 %v487_v24, 0.0  ;;  %v865_v58 = vsel %vm857_vm2, %v863_v31, %v864_v44 }
 0x162   : > { %v688_v5 = vmul.f32 %v2811_v12, %v616_v32  ;;  %v790_v48 = vadd.f32 %v739_v8, %v648_v14  ;;  %v814_v47 = vmul.f32 %v2813_v13, %v616_v32  ;;  %v489_v43 = vpop.f32.mrf.mxu0  ;;  %v569_v52 = vpop.f32.mrf.mxu1  ;;  %v974_v60 = vmul.f32 %v2822_v34, %v616_v32 }
 0x163   : > { %v1099_v3 = vmul.f32 %v2824_v35, %v616_v32  ;;  %v2926_v4 = vmin.f32 %v587_v17, 6.0  ;;  %v490_v30 = vadd.f32 %v2801_v62, %v489_v43  ;;  %v2933_v8 = vmul.f32 %v2813_v13, %v2876_v29 }
 0x164   : > { %v740_v24 = vrot.slane %v688_v5, 1  ;;  %v866_v50 = vrot.slane %v814_v47, 2  ;;  %v2929_v49 = vadd.f32 %v865_v58, %v790_v48  ;;  %v2091_v19 = vpop.f32.mrf.mxu0  ;;  %v2131_v14 = vpop.f32.mrf.mxu1  ;;  %v1023_v31 = vrot.slane %v974_v60, 1 }
 0x165   : > { %v1148_v26 = vrot.slane %v1099_v3, 2  ;;  %v588_v46 = vmax.f32 %v490_v30, 0.0  ;;  %v2937_v32 = vmul.f32 %v2822_v34, %v2876_v29  ;;  %v2944_v19 = vmul.f32 %v2824_v35, %v2876_v29 }
 0x166   : > { %v741_v17 = vsel %vm731_vm1, %v738_v15, %v740_v24  ;;  %v867_v5 = vsel %vm857_vm2, %v864_v44, %v866_v50  ;;  %v494_v47 = vpop.f32.mrf.mxu0  ;;  %v2946_v58 = vpop.f32.mrf.mxu1  ;;  %v1024_v60 = vsel %vm731_vm1, %v3817_v23, %v1023_v31  ;;  %v3038_v23 = vmul.f32 %v2813_v13, %v2866_v36 }
 0x167   : > { %3878 = vst [vmem:[#allocation37_spill] sm:$0xff] %v2937_v32  ;;  %3879 = vst [vmem:[#allocation38_spill] sm:$0xff] %v2944_v19  ;;  %v791_v43 = vadd.f32 %v741_v17, %v649_v51  ;;  %v2954_v15 = vsel %vm857_vm2, %v3816_v55, %v1148_v26  ;;  %v2956_v50 = vmin.f32 %v588_v46, 6.0  ;;  %v2958_v44 = vadd.f32 %v1024_v60, %v952_v7  ;;  %v3053_v19 = vld [vmem:[#allocation7 + $0x6] ss:$0 sm:$0xff] }
 0x168   : > { %v495_v3 = vadd.f32 %v2801_v62, %v494_v47  ;;  %v2094_v30 = vpop.f32.mrf.mxu0  ;;  %v2134_v14 = vpop.f32.mrf.mxu1  ;;  %v2971_v46 = vmin.f32 %v605_v6, 6.0  ;;  %v562_v7 = vadd.f32 %v2801_v62, %v2888_v25  ;;  %v567_v60 = vadd.f32 %v2801_v62, %v566_v9 }
 0x169   : > { %v2963_v17 = vadd.f32 %v867_v5, %v791_v43  ;;  %v2967_v31 = vmul.f32 %v2822_v34, %v2956_v50  ;;  %v570_v30 = vadd.f32 %v2801_v62, %v569_v52  ;;  %v704_v5 = vmul.f32 %v2811_v12, %v2858_v10 }
 0x16a   : > { %3880 = vst [vmem:[#allocation39_spill] sm:$0xff] %v2971_v46  ;;  %v589_v26 = vmax.f32 %v495_v3, 0.0  ;;  %v497_v47 = vpop.f32.mrf.mxu0  ;;  %v2979_v43 = vpop.f32.mrf.mxu1  ;;  %v606_v6 = vmax.f32 %v562_v7, 0.0  ;;  %v2985_v51 = vmul.f32 %v2811_v12, %v2866_v36  ;;  %v607_v9 = vmax.f32 %v567_v60, 0.0 }
 0x16b   : > { %v498_v53 = vadd.f32 %v2801_v62, %v497_v47  ;;  %v608_v24 = vmax.f32 %v570_v30, 0.0  ;;  %v767_v52 = vrot.slane %v704_v5, 1  ;;  %v830_v47 = vmul.f32 %v2813_v13, %v2858_v10 }
 0x16c   : > { %v2987_v25 = vmin.f32 %v589_v26, 6.0  ;;  %v2095_v3 = vpop.f32.mrf.mxu0  ;;  %v2135_v48 = vpop.f32.mrf.mxu1  ;;  %v2989_v45 = vmin.f32 %v606_v6, 6.0  ;;  %v637_v6 = vmin.f32 %v607_v9, 6.0  ;;  %v3841_v37 = vrot.slane %v3038_v23, 2 }
 0x16d   : > { %v590_v55 = vmax.f32 %v498_v53, 0.0  ;;  %v3011_v3 = vmin.f32 %v608_v24, 6.0  ;;  %v3885_v24 = vrot.slane %v2967_v31, 1 }
 0x16e   : > { %v2996_v7 = vmul.f32 %v2811_v12, %v2987_v25  ;;  %v3000_v26 = vmul.f32 %v2813_v13, %v2987_v25  ;;  %v977_v60 = vmul.f32 %v2822_v34, %v2987_v25  ;;  %v3006_v48 = vmul.f32 %v2824_v35, %v2987_v25  ;;  %v502_v30 = vpop.f32.mrf.mxu0 }
 0x16f   : > { %v3008_v5 = vmin.f32 %v590_v55, 6.0  ;;  %v503_v53 = vadd.f32 %v2801_v62, %v502_v30  ;;  %v3017_v27 = vmul.f32 %v2822_v34, %v637_v6  ;;  %v3020_v55 = vmul.f32 %v2824_v35, %v637_v6 }
 0x170   : > { %3881 = vst [vmem:[#allocation40_spill] sm:$0xff] %v2996_v7  ;;  %3882 = vst [vmem:[#allocation41_spill] sm:$0xff] %v3000_v26  ;;  %v1028_v22 = vrot.slane %v977_v60, 1  ;;  %v2098_v16 = vpop.f32.mrf.mxu0  ;;  %v3023_v30 = vmul.f32 %v2846_v56, %v637_v6  ;;  %v3031_v60 = vmul.f32 %v2848_v57, %v637_v6  ;;  %v3112_v10 = vmul.f32 %v2848_v57, %v3011_v3 }
 0x171   : > { %3883 = vst [vmem:[#allocation42_spill] sm:$0xff] %v3006_v48  ;;  %v591_v21 = vmax.f32 %v503_v53, 0.0  ;;  %v3887_v16 = vrot.slane %v2985_v51, 1 }
 0x172   : > { %3884 = vst [vmem:[#allocation43_spill] sm:$0xff] %v3023_v30  ;;  %v3028_v9 = vsel %vm731_vm1, %v3885_v24, %v1028_v22  ;;  %v505_v14 = vpop.f32.mrf.mxu0  ;;  %3886 = vst [vmem:[#allocation44_spill] sm:$0xff] %v3031_v60 }
 0x173   : > { %v769_v53 = vsel %vm731_vm1, %v767_v52, %v3887_v16  ;;  %v3040_v33 = vmin.f32 %v591_v21, 6.0  ;;  %v506_v28 = vadd.f32 %v2801_v62, %v505_v14  ;;  %v893_v52 = vrot.slane %v830_v47, 2  ;;  %3892 = vst [vmem:[#allocation47_spill] sm:$0xff] %v3112_v10 }
 0x174   : > { %v2099_v24 = vpop.f32.mrf.mxu0  ;;  %v802_v38 = vadd.f32 %v769_v53, %v2880_v59  ;;  %v949_v21 = vmul.f32 %v2874_v54, %v2971_v46  ;;  %v993_v14 = vmul.f32 %v2822_v34, %v2971_v46  ;;  %v1118_v59 = vmul.f32 %v2824_v35, %v2971_v46 }
 0x175   : > { %v592_v16 = vmax.f32 %v506_v28, 0.0  ;;  %v3057_v24 = vmul.f32 %v2822_v34, %v2989_v45  ;;  %v3063_v28 = vmul.f32 %v2824_v35, %v2989_v45  ;;  %v1236_v47 = vmul.f32 %v3053_v19, %v3011_v3 }
 0x176   : > { %v510_v22 = vpop.f32.mrf.mxu0  ;;  %v895_v6 = vsel %vm857_vm2, %v893_v52, %v3841_v37  ;;  %v1055_v60 = vrot.slane %v993_v14, 1  ;;  %v1180_v46 = vrot.slane %v1118_v59, 2  ;;  %v3108_v59 = vmul.f32 %v2846_v56, %v3011_v3 }
 0x177   : > { %v622_v53 = vmin.f32 %v592_v16, 6.0  ;;  %v511_v32 = vadd.f32 %v2801_v62, %v510_v22  ;;  %v928_v29 = vadd.f32 %v895_v6, %v802_v38  ;;  %v3895_v3 = vrot.slane %v2910_v18, 2 }
 0x178   : > { %v2102_v30 = vpop.f32.mrf.mxu0 }
 0x179   : > { %v3074_v39 = vmul.f32 %v2811_v12, %v622_v53  ;;  %v3077_v63 = vmul.f32 %v2813_v13, %v622_v53  ;;  %v3080_v22 = vmul.f32 %v2822_v34, %v622_v53  ;;  %v3083_v16 = vmul.f32 %v2824_v35, %v622_v53 }
 0x17a   : > { %v3086_v30 = vmul.f32 %v2846_v56, %v622_v53  ;;  %v3089_v38 = vmul.f32 %v2848_v57, %v622_v53  ;;  %v593_v6 = vmax.f32 %v511_v32, 0.0  ;;  %v513_v52 = vpop.f32.mrf.mxu0  ;;  %v965_v14 = vadd.f32 %v949_v21, %v928_v29 }
 0x17b   : > { %3888 = vst [vmem:[#allocation45_spill] sm:$0xff] %v3074_v39  ;;  %3889 = vst [vmem:[#allocation46_spill] sm:$0xff] %v3077_v63  ;;  %v514_v53 = vadd.f32 %v2801_v62, %v513_v52  ;;  %v3890_v32 = vrot.slane %v3057_v24, 1  ;;  %v3891_v21 = vrot.slane %v3063_v28, 2 }
 0x17c   : > { %v3097_v7 = vmin.f32 %v593_v6, 6.0  ;;  %v2103_v48 = vpop.f32.mrf.mxu0 }
 0x17d   : > { %v1057_v29 = vsel %vm731_vm1, %v1055_v60, %v3890_v32  ;;  %v1182_v37 = vsel %vm857_vm2, %v1180_v46, %v3891_v21  ;;  %v594_v6 = vmax.f32 %v514_v53, 0.0  ;;  %v951_v48 = vadd.f32 %v2891_v20, %v2872_v42 }
 0x17e   : > { %v1090_v40 = vadd.f32 %v1057_v29, %v965_v14  ;;  %v518_v52 = vpop.f32.mrf.mxu0  ;;  %v3893_v60 = vrot.slane %v2907_v61, 1  ;;  %v3894_v32 = vrot.slane %v2894_v1, 1  ;;  %v3896_v14 = vrot.slane %v2897_v2, 2 }
 0x17f   : > { %v519_v0 = vadd.f32 %v2801_v62, %v518_v52  ;;  %v3129_v29 = vmin.f32 %v594_v6, 6.0  ;;  %v1202_v1 = vadd.f32 %v2954_v15, %v2958_v44  ;;  %v1223_v52 = vmul.f32 %v3053_v19, %v2956_v50 }
 0x180   : > { %v1022_v46 = vsel %vm731_vm1, %v3894_v32, %v3893_v60  ;;  %v1147_v53 = vsel %vm857_vm2, %v3896_v14, %v3895_v3  ;;  %v1215_v42 = vadd.f32 %v1182_v37, %v1090_v40  ;;  %v2106_v61 = vpop.f32.mrf.mxu0  ;;  %v1222_v32 = vmul.f32 %v3053_v19, %v2926_v4 }
 0x181   : > { %v1076_v20 = vadd.f32 %v1022_v46, %v951_v48  ;;  %v595_v60 = vmax.f32 %v519_v0, 0.0  ;;  %v1259_v2 = vmul.f32 %v2846_v56, %v2926_v4  ;;  %v1260_v37 = vmul.f32 %v2846_v56, %v2956_v50 }
 0x182   : > { %v3139_v18 = vadd.f32 %v1236_v47, %v1215_v42  ;;  %v1261_v40 = vmul.f32 %v2846_v56, %v2987_v25  ;;  %v521_v15 = vpop.f32.mrf.mxu0  ;;  %v1239_v44 = vadd.f32 %v1223_v52, %v1202_v1  ;;  %v1384_v46 = vmul.f32 %v2848_v57, %v2926_v4 }
 0x183   : > { %v1201_v6 = vadd.f32 %v1147_v53, %v1076_v20  ;;  %v3145_v0 = vmin.f32 %v595_v60, 6.0  ;;  %v1307_v48 = vrot.slane %v1259_v2, 1  ;;  %v1308_v14 = vrot.slane %v1260_v37, 1 }
 0x184   : > { %3897 = vst [vmem:[#allocation48_spill] sm:$0xff] %v3139_v18  ;;  %v1310_v61 = vrot.slane %v1261_v40, 1  ;;  %v1385_v47 = vmul.f32 %v2848_v57, %v2956_v50  ;;  %v2107_v53 = vpop.f32.mrf.mxu0  ;;  %v1386_v2 = vmul.f32 %v2848_v57, %v2987_v25  ;;  %v661_v25 = vmul.f32 %v2809_v11, %v2866_v36 }
 0x185   : > { %v1238_v3 = vadd.f32 %v1222_v32, %v1201_v6  ;;  %v3153_v42 = vmul.f32 %v2811_v12, %v3145_v0  ;;  %v3157_v20 = vmul.f32 %v2813_v13, %v3145_v0  ;;  %v3161_v1 = vmul.f32 %v2822_v34, %v3145_v0 }
 0x186   : > { %v3165_v60 = vmul.f32 %v2824_v35, %v3145_v0  ;;  %v1309_v32 = vsel %vm731_vm1, %v1307_v48, %v1308_v14  ;;  %v1311_v52 = vsel %vm731_vm1, %v1308_v14, %v1310_v61  ;;  %v1432_v6 = vrot.slane %v1384_v46, 2  ;;  %v526_v37 = vpop.f32.mrf.mxu0 }
 0x187   : > { %v1363_v10 = vadd.f32 %v1309_v32, %v1238_v3  ;;  %v1364_v18 = vadd.f32 %v1311_v52, %v1239_v44  ;;  %v1433_v63 = vrot.slane %v1385_v47, 2  ;;  %v1435_v39 = vrot.slane %v1386_v2, 2 }
 0x188   : > { %v2110_v48 = vpop.f32.mrf.mxu0  ;;  %v575_v14 = vadd.f32 %v2801_v62, %v2946_v58  ;;  %v3898_v46 = vrot.slane %v2915_v41, 1  ;;  %v3899_v61 = vrot.slane %v2985_v51, 1  ;;  %v3900_v40 = vrot.slane %v2933_v8, 2  ;;  %v3194_v58 = vld [vmem:[%s3808_s4] ss:$0 sm:$0xff] }
 0x189   : > { %v3901_v3 = vrot.slane %v3038_v23, 2  ;;  %v1434_v47 = vsel %vm857_vm2, %v1432_v6, %v1433_v63  ;;  %v1436_v32 = vsel %vm857_vm2, %v1433_v63, %v1435_v39  ;;  %v950_v41 = vmul.f32 %v2874_v54, %v2989_v45 }
 0x18a   : > { %v771_v53 = vsel %vm731_vm1, %v3899_v61, %v3898_v46  ;;  %v3902_v51 = vrot.slane %v3017_v27, 1  ;;  %v3903_v8 = vrot.slane %v3057_v24, 1  ;;  %v529_v52 = vpop.f32.mrf.mxu0  ;;  %v1488_v2 = vadd.f32 %v1434_v47, %v1363_v10 }
 0x18b   : > { %v897_v44 = vsel %vm857_vm2, %v3901_v3, %v3900_v40  ;;  %v1489_v40 = vadd.f32 %v1436_v32, %v1364_v18  ;;  %v609_v6 = vmax.f32 %v575_v14, 0.0  ;;  %v803_v48 = vadd.f32 %v771_v53, %v661_v25 }
 0x18c   : > { %v1059_v23 = vsel %vm731_vm1, %v3903_v8, %v3902_v51  ;;  %v3904_v39 = vrot.slane %v3020_v55, 2  ;;  %v3905_v63 = vmov %v3891_v21  ;;  %v522_v61 = vadd.f32 %v2801_v62, %v521_v15  ;;  %v2111_v3 = vpop.f32.mrf.mxu0 }
 0x18d   : > { %v578_v27 = vadd.f32 %v2801_v62, %v2979_v43  ;;  %v527_v24 = vadd.f32 %v2801_v62, %v526_v37  ;;  %v1511_v51 = vadd.f32 %v3194_v58, %v1488_v2  ;;  %v1512_v10 = vadd.f32 %v3194_v58, %v1489_v40 }
 0x18e   : > { %v1184_v46 = vsel %vm857_vm2, %v3905_v63, %v3904_v39  ;;  %v639_v18 = vmin.f32 %v609_v6, 6.0  ;;  %v929_v53 = vadd.f32 %v897_v44, %v803_v48  ;;  %v596_v14 = vmax.f32 %v522_v61, 0.0  ;;  %v3215_v47 = vpop.f32.mrf.mxu0 }
 0x18f   : > { %v610_v55 = vmax.f32 %v578_v27, 0.0  ;;  %v597_v25 = vmax.f32 %v527_v24, 0.0  ;;  %v530_v28 = vadd.f32 %v2801_v62, %v529_v52  ;;  %v1527_v15 = vmax.f32 %v1511_v51, 0.0 }
 0x190   : > { %v1528_v32 = vmax.f32 %v1512_v10, 0.0  ;;  %v966_v8 = vadd.f32 %v950_v41, %v929_v53  ;;  %v1237_v43 = vmul.f32 %v3053_v19, %v639_v18  ;;  %v1281_v37 = vmul.f32 %v2846_v56, %v639_v18  ;;  %v2114_v6 = vpop.f32.mrf.mxu0 }
 0x191   : > { %v3220_v2 = vmul.f32 %v2848_v57, %v639_v18  ;;  %v3222_v40 = vmin.f32 %v596_v14, 6.0  ;;  %v640_v44 = vmin.f32 %v610_v55, 6.0  ;;  %v1543_v48 = vmin.f32 %v1527_v15, 6.0 }
 0x192   : > { %v1544_v39 = vmin.f32 %v1528_v32, 6.0  ;;  %v1091_v63 = vadd.f32 %v1059_v23, %v966_v8  ;;  %v3224_v52 = vmin.f32 %v597_v25, 6.0  ;;  %v1343_v61 = vrot.slane %v1281_v37, 1  ;;  %v537_v3 = vpop.f32.mrf.mxu0 }
 0x193   : > { %v3848_v27 = vrot.slane %v3220_v2, 2  ;;  %v1282_v41 = vmul.f32 %v2846_v56, %v640_v44  ;;  %v1407_v24 = vmul.f32 %v2848_v57, %v640_v44  ;;  %v598_v18 = vmax.f32 %v530_v28, 0.0 }
 0x194   : > { %v1559_v51 = vpack.c.bf16 %v1544_v39, %v1543_v48  ;;  %v1216_v10 = vadd.f32 %v1184_v46, %v1091_v63  ;;  %v937_v53 = vmul.f32 %v2874_v54, %v2926_v4  ;;  %v3906_v14 = vrot.slane %v3108_v59, 1  ;;  %v2115_v32 = vpop.f32.mrf.mxu0 }
 0x195   : > { %v1345_v55 = vrot.slane %v1282_v41, 1  ;;  %v1470_v25 = vrot.slane %v1407_v24, 2  ;;  %v938_v15 = vmul.f32 %v2874_v54, %v2956_v50  ;;  %v3238_v37 = vmin.f32 %v598_v18, 6.0 }
 0x196   : > { %v3234_v23 = vsel %vm731_vm1, %v3906_v14, %v1343_v61  ;;  %2152 = vmatprep.mubr.bf16.mxu1 %v1559_v51  ;;  %v1253_v8 = vadd.f32 %v1237_v43, %v1216_v10  ;;  %v953_v46 = vadd.f32 %v937_v53, %v2929_v49  ;;  %v975_v28 = vmul.f32 %v2822_v34, %v2926_v4 }
 0x197   : > { %v1346_v59 = vsel %vm731_vm1, %v1343_v61, %v1345_v55  ;;  %v3247_v44 = vsel %vm857_vm2, %v3848_v27, %v1470_v25  ;;  %v954_v6 = vadd.f32 %v938_v15, %v2963_v17  ;;  %v1100_v48 = vmul.f32 %v2824_v35, %v2926_v4 }
 0x198   : > { %v3252_v43 = vadd.f32 %v1346_v59, %v1253_v8  ;;  %v3256_v49 = vmul.f32 %v2811_v12, %v3238_v37  ;;  %v3260_v39 = vmul.f32 %v2813_v13, %v3238_v37  ;;  %v3264_v63 = vmul.f32 %v2822_v34, %v3238_v37 }
 0x199   : > { %v3268_v17 = vmul.f32 %v2824_v35, %v3238_v37  ;;  %v1025_v61 = vrot.slane %v975_v28, 1  ;;  %v1079_v41 = vadd.f32 %v3028_v9, %v954_v6  ;;  %v1101_v24 = vmul.f32 %v2824_v35, %v2956_v50 }
 0x19a   : > { %v1150_v53 = vrot.slane %v1100_v48, 2  ;;  %v3907_v55 = vrot.slane %v2967_v31, 1  ;;  %v1224_v9 = vmul.f32 %v3053_v19, %v3008_v5  ;;  %v1225_v8 = vmul.f32 %v3053_v19, %v3040_v33  ;;  %v3908_v48 = vld [vmem:[#allocation42_spill] sm:$0xff] }
 0x19b   : > { %v1151_v15 = vrot.slane %v1101_v24, 2  ;;  %v1262_v28 = vmul.f32 %v2846_v56, %v3008_v5  ;;  %v1263_v59 = vmul.f32 %v2846_v56, %v3040_v33  ;;  %v3909_v31 = vrot.slane %v3908_v48, 2 }
 0x19c   : > { %v1027_v25 = vsel %vm731_vm1, %v1025_v61, %v3907_v55  ;;  %v1387_v24 = vmul.f32 %v2848_v57, %v3008_v5  ;;  %v535_v18 = vadd.f32 %v2801_v62, %v3215_v47 }
 0x19d   : > { %v1078_v32 = vadd.f32 %v1027_v25, %v953_v46  ;;  %v1152_v6 = vsel %vm857_vm2, %v1150_v53, %v1151_v15  ;;  %v1154_v61 = vsel %vm857_vm2, %v1151_v15, %v3909_v31  ;;  %v1388_v46 = vmul.f32 %v2848_v57, %v3040_v33 }
 0x19e   : > { %v1204_v25 = vadd.f32 %v1154_v61, %v1079_v41  ;;  %v1312_v27 = vrot.slane %v1262_v28, 1  ;;  %v1313_v10 = vrot.slane %v1263_v59, 1  ;;  %v1437_v51 = vrot.slane %v1387_v24, 2 }
 0x19f   : > { %v1203_v55 = vadd.f32 %v1152_v6, %v1078_v32  ;;  %v1438_v14 = vrot.slane %v1388_v46, 2  ;;  %v538_v53 = vadd.f32 %v2801_v62, %v537_v3  ;;  %v3910_v31 = vrot.slane %v3086_v30, 1 }
 0x1a0   : > { %v1241_v21 = vadd.f32 %v1225_v8, %v1204_v25  ;;  %v1314_v15 = vsel %vm731_vm1, %v1312_v27, %v1313_v10  ;;  %v3911_v41 = vrot.slane %v3089_v38, 2  ;;  %v599_v59 = vmax.f32 %v535_v18, 0.0 }
 0x1a1   : > { %v1240_v48 = vadd.f32 %v1224_v9, %v1203_v55  ;;  %v1316_v26 = vsel %vm731_vm1, %v1313_v10, %v3910_v31  ;;  %v1439_v32 = vsel %vm857_vm2, %v1437_v51, %v1438_v14  ;;  %v600_v6 = vmax.f32 %v538_v53, 0.0 }
 0x1a2   : > { %v1441_v28 = vsel %vm857_vm2, %v1438_v14, %v3911_v41  ;;  %v1366_v47 = vadd.f32 %v1316_v26, %v1241_v21  ;;  %v650_v62 = vmul.f32 %v2809_v11, %v2926_v4  ;;  %v651_v27 = vmul.f32 %v2809_v11, %v2956_v50 }
 0x1a3   : > { %v1365_v61 = vadd.f32 %v1314_v15, %v1240_v48  ;;  %v3311_v3 = vmin.f32 %v599_v59, 6.0  ;;  %v3313_v30 = vmin.f32 %v600_v6, 6.0  ;;  %v689_v51 = vmul.f32 %v2811_v12, %v2926_v4 }
 0x1a4   : > { %v690_v38 = vmul.f32 %v2811_v12, %v2956_v50  ;;  %v1491_v18 = vadd.f32 %v1441_v28, %v1366_v47  ;;  %v815_v26 = vmul.f32 %v2813_v13, %v2926_v4  ;;  %v816_v21 = vmul.f32 %v2813_v13, %v2956_v50  ;;  %v3912_v4 = vld [vmem:[#allocation40_spill] sm:$0xff]  ;;  %v3914_v47 = vld [vmem:[#allocation41_spill] sm:$0xff] }
 0x1a5   : > { %v1490_v10 = vadd.f32 %v1439_v32, %v1365_v61  ;;  %v742_v14 = vrot.slane %v689_v51, 1  ;;  %v939_v8 = vmul.f32 %v2874_v54, %v3008_v5  ;;  %v940_v24 = vmul.f32 %v2874_v54, %v3040_v33 }
 0x1a6   : > { %v743_v9 = vrot.slane %v690_v38, 1  ;;  %v1514_v55 = vadd.f32 %v3194_v58, %v1491_v18  ;;  %v868_v25 = vrot.slane %v815_v26, 2  ;;  %v869_v53 = vrot.slane %v816_v21, 2 }
 0x1a7   : > { %v1513_v46 = vadd.f32 %v3194_v58, %v1490_v10  ;;  %v3913_v15 = vrot.slane %v3912_v4, 1  ;;  %v978_v31 = vmul.f32 %v2822_v34, %v3008_v5  ;;  %v979_v32 = vmul.f32 %v2822_v34, %v3040_v33 }
 0x1a8   : > { %v744_v48 = vsel %vm731_vm1, %v742_v14, %v743_v9  ;;  %v1530_v28 = vmax.f32 %v1514_v55, 0.0  ;;  %v870_v61 = vsel %vm857_vm2, %v868_v25, %v869_v53  ;;  %v3915_v51 = vrot.slane %v3914_v47, 2 }
 0x1a9   : > { %v746_v50 = vsel %vm731_vm1, %v743_v9, %v3913_v15  ;;  %v1529_v41 = vmax.f32 %v1513_v46, 0.0  ;;  %v792_v59 = vadd.f32 %v744_v48, %v650_v62  ;;  %v1030_v10 = vrot.slane %v978_v31, 1 }
 0x1aa   : > { %v793_v6 = vadd.f32 %v746_v50, %v651_v27  ;;  %v872_v38 = vsel %vm857_vm2, %v869_v53, %v3915_v51  ;;  %v1031_v18 = vrot.slane %v979_v32, 1  ;;  %v1546_v21 = vmin.f32 %v1530_v28, 6.0 }
 0x1ab   : > { %v1545_v26 = vmin.f32 %v1529_v41, 6.0  ;;  %v918_v14 = vadd.f32 %v870_v61, %v792_v59  ;;  %v3916_v15 = vrot.slane %v3080_v22, 1  ;;  %v1103_v62 = vmul.f32 %v2824_v35, %v3008_v5 }
 0x1ac   : > { %v919_v9 = vadd.f32 %v872_v38, %v793_v6  ;;  %v1032_v4 = vsel %vm731_vm1, %v1030_v10, %v1031_v18  ;;  %v1104_v27 = vmul.f32 %v2824_v35, %v3040_v33  ;;  %v1226_v48 = vmul.f32 %v3053_v19, %v3097_v7 }
 0x1ad   : > { %v1034_v46 = vsel %vm731_vm1, %v1031_v18, %v3916_v15  ;;  %v1560_v55 = vpack.c.bf16 %v1546_v21, %v1545_v26  ;;  %v955_v25 = vadd.f32 %v939_v8, %v918_v14  ;;  %v1155_v50 = vrot.slane %v1103_v62, 2 }
 0x1ae   : > { %v956_v53 = vadd.f32 %v940_v24, %v919_v9  ;;  %v1156_v31 = vrot.slane %v1104_v27, 2  ;;  %v1227_v32 = vmul.f32 %v3053_v19, %v3129_v29  ;;  %v1265_v22 = vmul.f32 %v2846_v56, %v3097_v7 }
 0x1af   : > { %2153 = vmatmul.mubr.bf16.vlgmr.msra.gmra.mxu1 %v1560_v55  ;;  %v1080_v41 = vadd.f32 %v1032_v4, %v955_v25  ;;  %v1266_v59 = vmul.f32 %v2846_v56, %v3129_v29  ;;  %v1267_v8 = vmul.f32 %v2846_v56, %v3145_v0  ;;  %v3917_v6 = vrot.slane %v3083_v16, 2 }
 0x1b0   : > { %v1081_v28 = vadd.f32 %v1034_v46, %v956_v53  ;;  %v1157_v24 = vsel %vm857_vm2, %v1155_v50, %v1156_v31  ;;  %v1317_v47 = vrot.slane %v1265_v22, 1  ;;  %v1390_v51 = vmul.f32 %v2848_v57, %v3097_v7 }
 0x1b1   : > { %v1159_v61 = vsel %vm857_vm2, %v1156_v31, %v3917_v6  ;;  %v1205_v38 = vadd.f32 %v1157_v24, %v1080_v41  ;;  %v1318_v18 = vrot.slane %v1266_v59, 1  ;;  %v1320_v26 = vrot.slane %v1267_v8, 1 }
 0x1b2   : > { %v1206_v10 = vadd.f32 %v1159_v61, %v1081_v28  ;;  %v1391_v21 = vmul.f32 %v2848_v57, %v3129_v29  ;;  %v1392_v14 = vmul.f32 %v2848_v57, %v3145_v0  ;;  %v1442_v9 = vrot.slane %v1390_v51, 2 }
 0x1b3   : > { %v652_v16 = vmul.f32 %v2809_v11, %v3008_v5  ;;  %v1242_v4 = vadd.f32 %v1226_v48, %v1205_v38  ;;  %v1319_v46 = vsel %vm731_vm1, %v1317_v47, %v1318_v18  ;;  %v1321_v62 = vsel %vm731_vm1, %v1318_v18, %v1320_v26 }
 0x1b4   : > { %v1243_v15 = vadd.f32 %v1227_v32, %v1206_v10  ;;  %v1443_v27 = vrot.slane %v1391_v21, 2  ;;  %v1445_v55 = vrot.slane %v1392_v14, 2  ;;  %v653_v25 = vmul.f32 %v2809_v11, %v3040_v33  ;;  %v3920_v14 = vld [vmem:[#allocation46_spill] sm:$0xff] }
 0x1b5   : > { %v692_v53 = vmul.f32 %v2811_v12, %v3008_v5  ;;  %v1367_v50 = vadd.f32 %v1319_v46, %v1242_v4  ;;  %v693_v31 = vmul.f32 %v2811_v12, %v3040_v33  ;;  %v818_v48 = vmul.f32 %v2813_v13, %v3008_v5 }
 0x1b6   : > { %v1368_v0 = vadd.f32 %v1321_v62, %v1243_v15  ;;  %v1444_v32 = vsel %vm857_vm2, %v1442_v9, %v1443_v27  ;;  %v1446_v22 = vsel %vm857_vm2, %v1443_v27, %v1445_v55  ;;  %v819_v28 = vmul.f32 %v2813_v13, %v3040_v33  ;;  %v3918_v13 = vld [vmem:[#allocation45_spill] sm:$0xff] }
 0x1b7   : > { %v747_v41 = vrot.slane %v692_v53, 1  ;;  %v1492_v11 = vadd.f32 %v1444_v32, %v1367_v50  ;;  %v748_v8 = vrot.slane %v693_v31, 1  ;;  %v873_v24 = vrot.slane %v818_v48, 2 }
 0x1b8   : > { %v1493_v59 = vadd.f32 %v1446_v22, %v1368_v0  ;;  %v874_v6 = vrot.slane %v819_v28, 2  ;;  %v941_v61 = vmul.f32 %v2874_v54, %v3097_v7  ;;  %v942_v12 = vmul.f32 %v2874_v54, %v3129_v29 }
 0x1b9   : > { %v981_v5 = vmul.f32 %v2822_v34, %v3097_v7  ;;  %v1515_v47 = vadd.f32 %v3194_v58, %v1492_v11  ;;  %v749_v33 = vsel %vm731_vm1, %v747_v41, %v748_v8  ;;  %v3919_v38 = vrot.slane %v3918_v13, 1 }
 0x1ba   : > { %v1516_v51 = vadd.f32 %v3194_v58, %v1493_v59  ;;  %v794_v18 = vadd.f32 %v749_v33, %v652_v16  ;;  %v875_v21 = vsel %vm857_vm2, %v873_v24, %v874_v6  ;;  %v3921_v9 = vrot.slane %v3920_v14, 2 }
 0x1bb   : > { %v751_v10 = vsel %vm731_vm1, %v748_v8, %v3919_v38  ;;  %v1531_v15 = vmax.f32 %v1515_v47, 0.0  ;;  %v982_v62 = vmul.f32 %v2822_v34, %v3129_v29  ;;  %v1035_v27 = vrot.slane %v981_v5, 1 }
 0x1bc   : > { %v795_v26 = vadd.f32 %v751_v10, %v653_v25  ;;  %v877_v4 = vsel %vm857_vm2, %v874_v6, %v3921_v9  ;;  %v1532_v46 = vmax.f32 %v1516_v51, 0.0  ;;  %v920_v55 = vadd.f32 %v875_v21, %v794_v18 }
 0x1bd   : > { %v1106_v50 = vmul.f32 %v2824_v35, %v3097_v7  ;;  %v1107_v16 = vmul.f32 %v2824_v35, %v3129_v29  ;;  %v1547_v25 = vmin.f32 %v1531_v15, 6.0  ;;  %v1036_v31 = vrot.slane %v982_v62, 1 }
 0x1be   : > { %v921_v53 = vadd.f32 %v877_v4, %v795_v26  ;;  %v1548_v0 = vmin.f32 %v1532_v46, 6.0  ;;  %v1228_v48 = vmul.f32 %v3053_v19, %v3222_v40  ;;  %v957_v32 = vadd.f32 %v941_v61, %v920_v55 }
 0x1bf   : > { %v1160_v41 = vrot.slane %v1106_v50, 2  ;;  %v1161_v28 = vrot.slane %v1107_v16, 2  ;;  %v1037_v11 = vsel %vm731_vm1, %v1035_v27, %v1036_v31  ;;  %v3922_v59 = vrot.slane %v3161_v1, 1  ;;  %v3433_v27 = vld [vmem:[#allocation7] ss:$0 sm:$0xff] }
 0x1c0   : > { %v958_v22 = vadd.f32 %v942_v12, %v921_v53  ;;  %v1561_v34 = vpack.c.bf16 %v1548_v0, %v1547_v25  ;;  %v1229_v35 = vmul.f32 %v3053_v19, %v3224_v52  ;;  %v1082_v24 = vadd.f32 %v1037_v11, %v957_v32  ;;  %v3441_v25 = vld [vmem:[#allocation7 + $0x1] ss:$0 sm:$0xff] }
 0x1c1   : > { %v1039_v8 = vsel %vm731_vm1, %v1036_v31, %v3922_v59  ;;  %v1162_v5 = vsel %vm857_vm2, %v1160_v41, %v1161_v28  ;;  %v3923_v47 = vrot.slane %v3165_v60, 2  ;;  %v1268_v12 = vmul.f32 %v2846_v56, %v3222_v40 }
 0x1c2   : > { %v1083_v6 = vadd.f32 %v1039_v8, %v958_v22  ;;  %2156 = vmatprep.mubr.bf16.mxu1 %v1561_v34  ;;  %v1269_v1 = vmul.f32 %v2846_v56, %v3224_v52  ;;  %v1270_v51 = vmul.f32 %v2846_v56, %v3238_v37  ;;  %v1393_v33 = vmul.f32 %v2848_v57, %v3222_v40 }
 0x1c3   : > { %v1164_v61 = vsel %vm857_vm2, %v1161_v28, %v3923_v47  ;;  %v1207_v13 = vadd.f32 %v1162_v5, %v1082_v24  ;;  %v1394_v60 = vmul.f32 %v2848_v57, %v3224_v52  ;;  %v1395_v10 = vmul.f32 %v2848_v57, %v3238_v37 }
 0x1c4   : > { %v1208_v38 = vadd.f32 %v1164_v61, %v1083_v6  ;;  %v1322_v18 = vrot.slane %v1268_v12, 1  ;;  %v1323_v26 = vrot.slane %v1269_v1, 1  ;;  %v1325_v21 = vrot.slane %v1270_v51, 1 }
 0x1c5   : > { %v1447_v14 = vrot.slane %v1393_v33, 2  ;;  %v1244_v9 = vadd.f32 %v1228_v48, %v1207_v13  ;;  %v1448_v15 = vrot.slane %v1394_v60, 2  ;;  %v1450_v46 = vrot.slane %v1395_v10, 2  ;;  %v3447_v48 = vld [vmem:[#allocation7 + $0x2] ss:$0 sm:$0xff] }
 0x1c6   : > { %v1245_v4 = vadd.f32 %v1229_v35, %v1208_v38  ;;  %v1324_v56 = vsel %vm731_vm1, %v1322_v18, %v1323_v26  ;;  %v1326_v62 = vsel %vm731_vm1, %v1323_v26, %v1325_v21  ;;  %v654_v55 = vmul.f32 %v3433_v27, %v3097_v7  ;;  %v3473_v21 = vld [vmem:[#allocation7 + $0x5] ss:$0 sm:$0xff] }
 0x1c7   : > { %v655_v57 = vmul.f32 %v3433_v27, %v3129_v29  ;;  %v1369_v37 = vadd.f32 %v1324_v56, %v1244_v9  ;;  %v1449_v50 = vsel %vm857_vm2, %v1447_v14, %v1448_v15  ;;  %v1451_v16 = vsel %vm857_vm2, %v1448_v15, %v1450_v46 }
 0x1c8   : > { %v1370_v53 = vadd.f32 %v1326_v62, %v1245_v4  ;;  %v695_v0 = vmul.f32 %v3441_v25, %v3097_v7  ;;  %v696_v31 = vmul.f32 %v3441_v25, %v3129_v29  ;;  %v821_v32 = vmul.f32 %v3447_v48, %v3097_v7  ;;  %v3459_v7 = vld [vmem:[#allocation7 + $0x4] ss:$0 sm:$0xff] }
 0x1c9   : > { %v822_v22 = vmul.f32 %v3447_v48, %v3129_v29  ;;  %v1494_v41 = vadd.f32 %v1449_v50, %v1369_v37  ;;  %v943_v34 = vmul.f32 %v2874_v54, %v3222_v40  ;;  %v944_v11 = vmul.f32 %v2874_v54, %v3224_v52 }
 0x1ca   : > { %v1495_v28 = vadd.f32 %v1451_v16, %v1370_v53  ;;  %v752_v59 = vrot.slane %v695_v0, 1  ;;  %v753_v8 = vrot.slane %v696_v31, 1  ;;  %v878_v35 = vrot.slane %v821_v32, 2 }
 0x1cb   : > { %v879_v24 = vrot.slane %v822_v22, 2  ;;  %v1517_v6 = vadd.f32 %v3194_v58, %v1494_v41  ;;  %v984_v29 = vmul.f32 %v3459_v7, %v3222_v40  ;;  %v985_v47 = vmul.f32 %v3459_v7, %v3224_v52 }
 0x1cc   : > { %v1518_v5 = vadd.f32 %v3194_v58, %v1495_v28  ;;  %v754_v61 = vsel %vm731_vm1, %v752_v59, %v753_v8  ;;  %v3924_v54 = vrot.slane %v3153_v42, 1  ;;  %v3925_v51 = vrot.slane %v3157_v20, 2  ;;  %v3497_v59 = vld [vmem:[#allocation7 + $0x8] ss:$0 sm:$0xff] }
 0x1cd   : > { %v880_v1 = vsel %vm857_vm2, %v878_v35, %v879_v24  ;;  %v1533_v13 = vmax.f32 %v1517_v6, 0.0  ;;  %v796_v60 = vadd.f32 %v754_v61, %v654_v55  ;;  %v1040_v18 = vrot.slane %v984_v29, 1 }
 0x1ce   : > { %v756_v12 = vsel %vm731_vm1, %v753_v8, %v3924_v54  ;;  %v882_v33 = vsel %vm857_vm2, %v879_v24, %v3925_v51  ;;  %v1534_v38 = vmax.f32 %v1518_v5, 0.0  ;;  %v1041_v26 = vrot.slane %v985_v47, 1  ;;  %v3928_v24 = vld [vmem:[#allocation34_spill] sm:$0xff] }
 0x1cf   : > { %v797_v10 = vadd.f32 %v756_v12, %v655_v57  ;;  %v1109_v14 = vmul.f32 %v3473_v21, %v3222_v40  ;;  %v1110_v42 = vmul.f32 %v3473_v21, %v3224_v52  ;;  %v1549_v9 = vmin.f32 %v1533_v13, 6.0 }
 0x1d0   : > { %v1550_v4 = vmin.f32 %v1534_v38, 6.0  ;;  %v922_v15 = vadd.f32 %v880_v1, %v796_v60  ;;  %v1042_v46 = vsel %vm731_vm1, %v1040_v18, %v1041_v26  ;;  %v3926_v56 = vrot.slane %v3264_v63, 1  ;;  %v3491_v63 = vld [vmem:[#allocation7 + $0x7] ss:$0 sm:$0xff] }
 0x1d1   : > { %v923_v20 = vadd.f32 %v882_v33, %v797_v10  ;;  %v1165_v55 = vrot.slane %v1109_v14, 2  ;;  %v1166_v57 = vrot.slane %v1110_v42, 2  ;;  %v1230_v16 = vmul.f32 %v3053_v19, %v3311_v3  ;;  %v3929_v10 = vld [vmem:[#allocation33_spill] sm:$0xff] }
 0x1d2   : > { %v1044_v62 = vsel %vm731_vm1, %v1041_v26, %v3926_v56  ;;  %v1562_v37 = vpack.c.bf16 %v1550_v4, %v1549_v9  ;;  %v959_v53 = vadd.f32 %v943_v34, %v922_v15  ;;  %v3927_v31 = vrot.slane %v3268_v17, 2 }
 0x1d3   : > { %v960_v50 = vadd.f32 %v944_v11, %v923_v20  ;;  %v1167_v0 = vsel %vm857_vm2, %v1165_v55, %v1166_v57  ;;  %v1231_v22 = vmul.f32 %v3053_v19, %v3313_v30  ;;  %v1271_v41 = vmul.f32 %v3491_v63, %v3311_v3 }
 0x1d4   : > { %v1169_v32 = vsel %vm857_vm2, %v1166_v57, %v3927_v31  ;;  %2157 = vmatmul.mubr.bf16.gmra.mxu1 %v1562_v37  ;;  %v1084_v28 = vadd.f32 %v1042_v46, %v959_v53  ;;  %v1272_v11 = vmul.f32 %v3491_v63, %v3313_v30  ;;  %v1396_v17 = vmul.f32 %v3497_v59, %v3311_v3  ;;  %v3526_v37 = vld [vmem:[#allocation7 + $0x3] ss:$0 sm:$0xff] }
 0x1d5   : > { %v1085_v34 = vadd.f32 %v1044_v62, %v960_v50  ;;  %v1327_v8 = vrot.slane %v1271_v41, 1  ;;  %v1397_v35 = vmul.f32 %v3497_v59, %v3313_v30  ;;  %v1455_v6 = vrot.slane %v3928_v24, 2 }
 0x1d6   : > { %v656_v5 = vmul.f32 %v3433_v27, %v3222_v40  ;;  %v1209_v29 = vadd.f32 %v1167_v0, %v1084_v28  ;;  %v1328_v61 = vrot.slane %v1272_v11, 1  ;;  %v1452_v54 = vrot.slane %v1396_v17, 2 }
 0x1d7   : > { %v1210_v47 = vadd.f32 %v1169_v32, %v1085_v34  ;;  %v1453_v12 = vrot.slane %v1397_v35, 2  ;;  %v657_v1 = vmul.f32 %v3433_v27, %v3224_v52  ;;  %v698_v51 = vmul.f32 %v3441_v25, %v3222_v40 }
 0x1d8   : > { %v699_v33 = vmul.f32 %v3441_v25, %v3224_v52  ;;  %v1246_v13 = vadd.f32 %v1230_v16, %v1209_v29  ;;  %v1329_v60 = vsel %vm731_vm1, %v1327_v8, %v1328_v61  ;;  %v3930_v18 = vrot.slane %v3929_v10, 1 }
 0x1d9   : > { %v1247_v38 = vadd.f32 %v1231_v22, %v1210_v47  ;;  %v1454_v14 = vsel %vm857_vm2, %v1452_v54, %v1453_v12  ;;  %v1456_v42 = vsel %vm857_vm2, %v1453_v12, %v1455_v6  ;;  %v757_v9 = vrot.slane %v698_v51, 1  ;;  %v3933_v12 = vld [vmem:[#allocation31_spill] sm:$0xff] }
 0x1da   : > { %v1331_v26 = vsel %vm731_vm1, %v1328_v61, %v3930_v18  ;;  %v758_v4 = vrot.slane %v699_v33, 1  ;;  %v1371_v15 = vadd.f32 %v1329_v60, %v1246_v13  ;;  %v824_v46 = vmul.f32 %v3447_v48, %v3222_v40 }
 0x1db   : > { %v1372_v20 = vadd.f32 %v1331_v26, %v1247_v38  ;;  %v825_v56 = vmul.f32 %v3447_v48, %v3224_v52  ;;  %v3931_v55 = vrot.slane %v3256_v49, 1  ;;  %v945_v53 = vmul.f32 %v3526_v37, %v3311_v3  ;;  %v3935_v26 = vld [vmem:[#allocation32_spill] sm:$0xff] }
 0x1dc   : > { %v759_v62 = vsel %vm731_vm1, %v757_v9, %v758_v4  ;;  %v946_v50 = vmul.f32 %v3526_v37, %v3313_v30  ;;  %v1496_v16 = vadd.f32 %v1454_v14, %v1371_v15  ;;  %v883_v32 = vrot.slane %v824_v46, 2  ;;  %v3937_v9 = vld [vmem:[#allocation35_spill] sm:$0xff] }
 0x1dd   : > { %v761_v57 = vsel %vm731_vm1, %v758_v4, %v3931_v55  ;;  %v1497_v0 = vadd.f32 %v1456_v42, %v1372_v20  ;;  %v798_v40 = vadd.f32 %v759_v62, %v656_v5  ;;  %v884_v52 = vrot.slane %v825_v56, 2 }
 0x1de   : > { %v799_v31 = vadd.f32 %v761_v57, %v657_v1  ;;  %v987_v22 = vmul.f32 %v3459_v7, %v3311_v3  ;;  %v988_v49 = vmul.f32 %v3459_v7, %v3313_v30  ;;  %v1519_v41 = vadd.f32 %v3194_v58, %v1496_v16  ;;  %v3938_v57 = vld [vmem:[#allocation36_spill] sm:$0xff] }
 0x1df   : > { %v1520_v28 = vadd.f32 %v3194_v58, %v1497_v0  ;;  %v1112_v34 = vmul.f32 %v3473_v21, %v3311_v3  ;;  %v1113_v11 = vmul.f32 %v3473_v21, %v3313_v30  ;;  %v885_v17 = vsel %vm857_vm2, %v883_v32, %v884_v52 }
 0x1e0   : > { %v3932_v8 = vrot.slane %v3260_v39, 2  ;;  %v1045_v24 = vrot.slane %v987_v22, 1  ;;  %v1046_v6 = vrot.slane %v988_v49, 1  ;;  %v1535_v5 = vmax.f32 %v1519_v41, 0.0 }
 0x1e1   : > { %v1536_v29 = vmax.f32 %v1520_v28, 0.0  ;;  %v924_v47 = vadd.f32 %v885_v17, %v798_v40  ;;  %v3934_v1 = vrot.slane %v3933_v12, 1  ;;  %v1170_v33 = vrot.slane %v1112_v34, 2 }
 0x1e2   : > { %v887_v35 = vsel %vm857_vm2, %v884_v52, %v3932_v8  ;;  %v1047_v54 = vsel %vm731_vm1, %v1045_v24, %v1046_v6  ;;  %v1171_v13 = vrot.slane %v1113_v11, 2  ;;  %v1551_v38 = vmin.f32 %v1535_v5, 6.0 }
 0x1e3   : > { %v925_v61 = vadd.f32 %v887_v35, %v799_v31  ;;  %v1049_v51 = vsel %vm731_vm1, %v1046_v6, %v3934_v1  ;;  %v1552_v60 = vmin.f32 %v1536_v29, 6.0  ;;  %v961_v10 = vadd.f32 %v945_v53, %v924_v47 }
 0x1e4   : > { %v1172_v18 = vsel %vm857_vm2, %v1170_v33, %v1171_v13  ;;  %v3936_v14 = vrot.slane %v3935_v26, 2  ;;  %v1232_v4 = vmul.f32 %v3053_v19, %v3937_v9  ;;  %v1233_v15 = vmul.f32 %v3053_v19, %v2866_v36 }
 0x1e5   : > { %v962_v39 = vadd.f32 %v946_v50, %v925_v61  ;;  %v1563_v20 = vpack.c.bf16 %v1552_v60, %v1551_v38  ;;  %v1086_v46 = vadd.f32 %v1047_v54, %v961_v10  ;;  %v1274_v62 = vmul.f32 %v3491_v63, %v3937_v9 }
 0x1e6   : > { %v1174_v42 = vsel %vm857_vm2, %v1171_v13, %v3936_v14  ;;  %v1275_v55 = vmul.f32 %v3491_v63, %v2866_v36  ;;  %v1276_v53 = vmul.f32 %v3491_v63, %v3938_v57  ;;  %v1399_v50 = vmul.f32 %v3497_v59, %v3937_v9  ;;  %v3939_v14 = vld [vmem:[#allocation29_spill] sm:$0xff] }
 0x1e7   : > { %v1087_v56 = vadd.f32 %v1049_v51, %v962_v39  ;;  %v1400_v16 = vmul.f32 %v3497_v59, %v2866_v36  ;;  %2160 = vmatprep.mubr.bf16.mxu1 %v1563_v20  ;;  %v1211_v0 = vadd.f32 %v1172_v18, %v1086_v46  ;;  %v1332_v31 = vrot.slane %v1274_v62, 1 }
 0x1e8   : > { %v1401_v32 = vmul.f32 %v3497_v59, %v3938_v57  ;;  %v1333_v52 = vrot.slane %v1275_v55, 1  ;;  %v1335_v22 = vrot.slane %v1276_v53, 1  ;;  %v1457_v49 = vrot.slane %v1399_v50, 2 }
 0x1e9   : > { %v1212_v40 = vadd.f32 %v1174_v42, %v1087_v56  ;;  %v1458_v41 = vrot.slane %v1400_v16, 2  ;;  %v1248_v28 = vadd.f32 %v1232_v4, %v1211_v0  ;;  %v658_v17 = vmul.f32 %v3433_v27, %v3311_v3 }
 0x1ea   : > { %v1460_v11 = vrot.slane %v1401_v32, 2  ;;  %v1334_v8 = vsel %vm731_vm1, %v1332_v31, %v1333_v52  ;;  %v1336_v35 = vsel %vm731_vm1, %v1333_v52, %v1335_v22  ;;  %v659_v6 = vmul.f32 %v3433_v27, %v3313_v30  ;;  %v3943_v52 = vld [vmem:[#allocation37_spill] sm:$0xff] }
 0x1eb   : > { %v1249_v34 = vadd.f32 %v1233_v15, %v1212_v40  ;;  %v1459_v24 = vsel %vm857_vm2, %v1457_v49, %v1458_v41  ;;  %v1373_v5 = vadd.f32 %v1334_v8, %v1248_v28  ;;  %v701_v61 = vmul.f32 %v3441_v25, %v3311_v3  ;;  %v3941_v15 = vld [vmem:[#allocation30_spill] sm:$0xff]  ;;  %v3945_v28 = vld [vmem:[#allocation39_spill] sm:$0xff] }
 0x1ec   : > { %v1461_v47 = vsel %vm857_vm2, %v1458_v41, %v1460_v11  ;;  %v702_v54 = vmul.f32 %v3441_v25, %v3313_v30  ;;  %v827_v12 = vmul.f32 %v3447_v48, %v3311_v3  ;;  %v828_v1 = vmul.f32 %v3447_v48, %v3313_v30 }
 0x1ed   : > { %v1374_v29 = vadd.f32 %v1336_v35, %v1249_v34  ;;  %v947_v51 = vmul.f32 %v3526_v37, %v3937_v9  ;;  %v1498_v27 = vadd.f32 %v1459_v24, %v1373_v5  ;;  %v762_v13 = vrot.slane %v701_v61, 1  ;;  %v2319_v35 = vld [vmem:[#allocation7 + $0x6] ss:$0 sm:$0xff]  ;;  %v3946_v24 = vld [vmem:[#allocation38_spill] sm:$0xff] }
 0x1ee   : > { %v948_v38 = vmul.f32 %v3526_v37, %v2866_v36  ;;  %v763_v60 = vrot.slane %v702_v54, 1  ;;  %v888_v10 = vrot.slane %v827_v12, 2  ;;  %v889_v39 = vrot.slane %v828_v1, 2 }
 0x1ef   : > { %v1499_v33 = vadd.f32 %v1461_v47, %v1374_v29  ;;  %v990_v25 = vmul.f32 %v3459_v7, %v3937_v9  ;;  %v1521_v3 = vadd.f32 %v3194_v58, %v1498_v27  ;;  %v991_v30 = vmul.f32 %v3459_v7, %v2866_v36  ;;  %v3948_v27 = vld [vmem:[#allocation48_spill] sm:$0xff] }
 0x1f0   : > { %v1115_v48 = vmul.f32 %v3473_v21, %v3937_v9  ;;  %v764_v26 = vsel %vm731_vm1, %v762_v13, %v763_v60  ;;  %v3940_v37 = vrot.slane %v3939_v14, 1  ;;  %v890_v4 = vsel %vm857_vm2, %v888_v10, %v889_v39 }
 0x1f1   : > { %v1522_v18 = vadd.f32 %v3194_v58, %v1499_v33  ;;  %v3942_v20 = vrot.slane %v3941_v15, 2  ;;  %v1537_v56 = vmax.f32 %v1521_v3, 0.0  ;;  %v800_v55 = vadd.f32 %v764_v26, %v658_v17 }
 0x1f2   : > { %v766_v42 = vsel %vm731_vm1, %v763_v60, %v3940_v37  ;;  %v1050_v7 = vrot.slane %v990_v25, 1  ;;  %v1051_v53 = vrot.slane %v991_v30, 1  ;;  %v1116_v9 = vmul.f32 %v3473_v21, %v2866_v36  ;;  %v3952_v30 = vld [vmem:[#allocation43_spill] sm:$0xff]  ;;  %v3954_v37 = vld [vmem:[#allocation44_spill] sm:$0xff] }
 0x1f3   : > { %v892_v46 = vsel %vm857_vm2, %v889_v39, %v3942_v20  ;;  %v1538_v62 = vmax.f32 %v1522_v18, 0.0  ;;  %v801_v57 = vadd.f32 %v766_v42, %v659_v6  ;;  %v1175_v50 = vrot.slane %v1115_v48, 2 }
 0x1f4   : > { %v1553_v16 = vmin.f32 %v1537_v56, 6.0  ;;  %v926_v40 = vadd.f32 %v890_v4, %v800_v55  ;;  %v1052_v32 = vsel %vm731_vm1, %v1050_v7, %v1051_v53  ;;  %v3944_v22 = vrot.slane %v3943_v52, 1  ;;  %v3962_v7 = vld [vmem:[#allocation23_spill] sm:$0xff]  ;;  %v3967_v52 = vld [vmem:[#allocation25_spill] sm:$0xff] }
 0x1f5   : > { %v1554_v0 = vmin.f32 %v1538_v62, 6.0  ;;  %v927_v31 = vadd.f32 %v892_v46, %v801_v57  ;;  %v1176_v41 = vrot.slane %v1116_v9, 2  ;;  %v1234_v34 = vmul.f32 %v3053_v19, %v3945_v28  ;;  %v3956_v46 = vld [vmem:[#allocation27_spill] sm:$0xff]  ;;  %v3958_v62 = vld [vmem:[#allocation26_spill] sm:$0xff] }
 0x1f6   : > { %v1054_v49 = vsel %vm731_vm1, %v1051_v53, %v3944_v22  ;;  %v963_v17 = vadd.f32 %v947_v51, %v926_v40  ;;  %v1235_v36 = vmul.f32 %v2319_v35, %v2989_v45  ;;  %v3947_v6 = vrot.slane %v3946_v24, 2 }
 0x1f7   : > { %v1564_v11 = vpack.c.bf16 %v1554_v0, %v1553_v16  ;;  %v964_v8 = vadd.f32 %v948_v38, %v927_v31  ;;  %v1177_v21 = vsel %vm857_vm2, %v1175_v50, %v1176_v41  ;;  %v1277_v29 = vmul.f32 %v3491_v63, %v3945_v28  ;;  %v3950_v38 = vld [vmem:[#allocation47_spill] sm:$0xff]  ;;  %v3964_v0 = vld [vmem:[#allocation28_spill] sm:$0xff] }
 0x1f8   : > { %v1179_v5 = vsel %vm857_vm2, %v1176_v41, %v3947_v6  ;;  %v1278_v47 = vmul.f32 %v3491_v63, %v2989_v45  ;;  %v1088_v19 = vadd.f32 %v1052_v32, %v963_v17  ;;  %v1402_v54 = vmul.f32 %v3497_v59, %v3945_v28 }
 0x1f9   : > { %2161 = vmatmul.mubr.bf16.gmra.mxu1 %v1564_v11  ;;  %v1089_v61 = vadd.f32 %v1054_v49, %v964_v8  ;;  %v1403_v12 = vmul.f32 %v3497_v59, %v2989_v45  ;;  %v1337_v1 = vrot.slane %v1277_v29, 1  ;;  %v1377_v33 = vadd.f32 %v3234_v23, %v3948_v27 }
 0x1fa   : > { %v1338_v51 = vrot.slane %v1278_v47, 1  ;;  %v3949_v13 = vrot.slane %v3220_v2, 2  ;;  %v3951_v60 = vrot.slane %v3950_v38, 2  ;;  %v1213_v10 = vadd.f32 %v1177_v21, %v1088_v19 }
 0x1fb   : > { %v1214_v39 = vadd.f32 %v1179_v5, %v1089_v61  ;;  %v1462_v25 = vrot.slane %v1402_v54, 2  ;;  %v1463_v3 = vrot.slane %v1403_v12, 2  ;;  %v3953_v48 = vrot.slane %v3952_v30, 1  ;;  %v2320_v61 = vld [vmem:[#allocation2 + $0x60] sm:$0xff]  ;;  %v2321_v12 = vld [vmem:[#allocation2 + $0x68] sm:$0xff] }
 0x1fc   : > { %v1469_v63 = vsel %vm857_vm2, %v3951_v60, %v3949_v13  ;;  %v1339_v18 = vsel %vm731_vm1, %v1337_v1, %v1338_v51  ;;  %v1503_v23 = vadd.f32 %v3247_v44, %v3252_v43  ;;  %v1250_v26 = vadd.f32 %v1234_v34, %v1213_v10  ;;  %v3960_v44 = vld [vmem:[#allocation24_spill] sm:$0xff]  ;;  %v2324_v60 = vld [vmem:[#allocation2 + $0x70] sm:$0xff] }
 0x1fd   : > { %v1341_v45 = vsel %vm731_vm1, %v1338_v51, %v3953_v48  ;;  %v1502_v59 = vadd.f32 %v1469_v63, %v1377_v33  ;;  %v1251_v2 = vadd.f32 %v1235_v36, %v1214_v39  ;;  %v1464_v14 = vsel %vm857_vm2, %v1462_v25, %v1463_v3  ;;  %v2322_v51 = vld [vmem:[#allocation2 + $0x48] sm:$0xff]  ;;  %v2323_v33 = vld [vmem:[#allocation2 + $0x50] sm:$0xff]  ;;  %v2325_v63 = vld [vmem:[#allocation2 + $0x58] sm:$0xff] }
 0x1fe   : > { %v3955_v42 = vrot.slane %v3954_v37, 2  ;;  %v1526_v20 = vadd.f32 %v3194_v58, %v1503_v23  ;;  %v3957_v56 = vrot.slane %v3956_v46, 1  ;;  %v3959_v55 = vrot.slane %v3958_v62, 1  ;;  %v2327_v48 = vld [vmem:[#allocation2 + $0x98] sm:$0xff]  ;;  %v2330_v37 = vld [vmem:[#allocation2 + $0xa0] sm:$0xff] }
 0x1ff   : > { %v1525_v15 = vadd.f32 %v3194_v58, %v1502_v59  ;;  %v3961_v43 = vrot.slane %v3960_v44, 1  ;;  %v3963_v53 = vrot.slane %v3962_v7, 1  ;;  %v1375_v50 = vadd.f32 %v1339_v18, %v1250_v26  ;;  %v2326_v18 = vld [vmem:[#allocation2 + $0x90] sm:$0xff]  ;;  %v2328_v59 = vld [vmem:[#allocation2 + $0x78] sm:$0xff]  ;;  %v2329_v26 = vld [vmem:[#allocation2 + $0x80] sm:$0xff] }
 0x200   : > { %v1466_v4 = vsel %vm857_vm2, %v1463_v3, %v3955_v42  ;;  %v3651_v57 = vsel %vm731_vm1, %v3959_v55, %v3957_v56  ;;  %v1376_v16 = vadd.f32 %v1341_v45, %v1251_v2  ;;  %v3965_v40 = vrot.slane %v3964_v0, 1  ;;  %v2332_v62 = vld [vmem:[#allocation2 + $0xc0] sm:$0xff]  ;;  %v2333_v44 = vld [vmem:[#allocation2 + $0xc8] sm:$0xff] }
 0x201   : > { %v3658_v9 = vsel %vm731_vm1, %v3963_v53, %v3961_v43  ;;  %v3966_v31 = vmov %v3957_v56  ;;  %v3968_v22 = vrot.slane %v3967_v52, 1  ;;  %v3969_v49 = vmov %v3961_v43  ;;  %v2334_v7 = vld [vmem:[#allocation2 + $0xa8] sm:$0xff]  ;;  %v2337_v52 = vld [vmem:[#allocation2 + $0xb8] sm:$0xff] }
 0x202   : > { %v3665_v32 = vsel %vm731_vm1, %v3966_v31, %v3965_v40  ;;  %v1541_v28 = vmax.f32 %v1525_v15, 0.0  ;;  %v1542_v34 = vmax.f32 %v1526_v20, 0.0  ;;  %v1500_v11 = vadd.f32 %v1464_v14, %v1375_v50  ;;  %v2335_v50 = vld [vmem:[#allocation2 + $0xb0] sm:$0xff] }
 0x203   : > { %v3672_v41 = vsel %vm731_vm1, %v3969_v49, %v3968_v22  ;;  %v1501_v17 = vadd.f32 %v1466_v4, %v1376_v16  ;;  %v1774_v54 = vrot.slane %v2320_v61, 1  ;;  %v1775_v1 = vrot.slane %v2321_v12, 1  ;;  %v2331_v4 = vld [vmem:[#allocation2 + $0x88] sm:$0xff]  ;;  %v2336_v40 = vld [vmem:[#allocation2 + $0xd0] sm:$0xff] }
 0x204   : > { %v1557_v8 = vmin.f32 %v1541_v28, 6.0  ;;  %v1558_v35 = vmin.f32 %v1542_v34, 6.0  ;;  %v1523_v36 = vadd.f32 %v3194_v58, %v1500_v11  ;;  %v1769_v27 = vrot.slane %v2322_v51, 1  ;;  %v3699_v11 = vld [vmem:[%s3810_s6] ss:$0 sm:$0xff] }
 0x205   : > { %v1524_v21 = vadd.f32 %v3194_v58, %v1501_v17  ;;  %v1770_v13 = vrot.slane %v2323_v33, 1  ;;  %v1776_v38 = vsel %vm731_vm1, %v1774_v54, %v1775_v1  ;;  %v1777_v58 = vrot.slane %v2324_v60, 1 }
 0x206   : > { %v1566_v24 = vpack.c.bf16 %v1558_v35, %v1557_v8  ;;  %v1539_v6 = vmax.f32 %v1523_v36, 0.0  ;;  %v1772_v10 = vrot.slane %v2325_v63, 1  ;;  %v1784_v30 = vrot.slane %v2326_v18, 1 }
 0x207   : > { %v1540_v5 = vmax.f32 %v1524_v21, 0.0  ;;  %v1771_v39 = vsel %vm731_vm1, %v1769_v27, %v1770_v13  ;;  %v1778_v25 = vsel %vm731_vm1, %v1775_v1, %v1777_v58  ;;  %v1785_v45 = vrot.slane %v2327_v48, 1 }
 0x208   : > { %v1555_v29 = vmin.f32 %v1539_v6, 6.0  ;;  %v3680_v3 = vsel %vm731_vm1, %v1770_v13, %v1772_v10  ;;  %v1779_v23 = vrot.slane %v2328_v59, 1  ;;  %v1780_v2 = vrot.slane %v2329_v26, 1 }
 0x209   : > { %v1556_v47 = vmin.f32 %v1540_v5, 6.0  ;;  %v1786_v14 = vsel %vm731_vm1, %v1784_v30, %v1785_v45  ;;  %v1787_v42 = vrot.slane %v2330_v37, 1  ;;  %v1782_v15 = vrot.slane %v2331_v4, 1 }
 0x20a   : > { %v1781_v20 = vsel %vm731_vm1, %v1779_v23, %v1780_v2  ;;  %v1794_v55 = vrot.slane %v2332_v62, 1  ;;  %v1795_v43 = vrot.slane %v2333_v44, 1  ;;  %v1789_v53 = vrot.slane %v2334_v7, 1 }
 0x20b   : > { %v1565_v19 = vpack.c.bf16 %v1556_v47, %v1555_v29  ;;  %v1788_v46 = vsel %vm731_vm1, %v1785_v45, %v1787_v42  ;;  %v3686_v56 = vsel %vm731_vm1, %v1780_v2, %v1782_v15  ;;  %v1790_v16 = vrot.slane %v2335_v50, 1 }
 0x20c   : > { %v1796_v0 = vsel %vm731_vm1, %v1794_v55, %v1795_v43  ;;  %v1797_v31 = vrot.slane %v2336_v40, 1  ;;  %v1792_v22 = vrot.slane %v2337_v52, 1 }
 0x20d   : > { %2164 = vmatprep.mubr.bf16.mxu1 %v1565_v19  ;;  %v1791_v49 = vsel %vm731_vm1, %v1789_v53, %v1790_v16 }
 0x20e   : > { %2165 = vmatmul.mubr.bf16.gmra.mxu1 %v1566_v24  ;;  %v3691_v28 = vsel %vm731_vm1, %v1795_v43, %v1797_v31  ;;  %v3694_v34 = vsel %vm731_vm1, %v1790_v16, %v1792_v22 }
 0x26f   : > { %v2154_v17 = vpop.f32.mrf.mxu1 }
 0x270   : > { %v1681_v8 = vadd.f32 %v2154_v17, %v3699_v11 }
 0x271   : > { %v1672_v35 = vpop.f32.mrf.mxu1 }
 0x272   : > { %v1817_v36 = vadd.f32 %v3651_v57, %v1681_v8  ;;  %v1673_v21 = vadd.f32 %v3699_v11, %v1672_v35 }
 0x273   : > { %v2155_v24 = vpop.f32.mrf.mxu1 }
 0x274   : > { %1833 = vst [vmem:[%s2732_s22 + $0x10] sm:$0xff] %v1817_v36  ;;  %v1815_v6 = vadd.f32 %v3658_v9, %v1673_v21  ;;  %v1684_v5 = vadd.f32 %v2155_v24, %v3699_v11 }
 0x275   : > { %v1675_v29 = vpop.f32.mrf.mxu1 }
 0x276   : > { %1831 = vst [vmem:[%s2732_s22] sm:$0xff] %v1815_v6  ;;  %v1818_v47 = vadd.f32 %v3665_v32, %v1684_v5  ;;  %v1676_v19 = vadd.f32 %v3699_v11, %v1675_v29 }
 0x278   : > { %1834 = vst [vmem:[%s2732_s22 + $0x18] sm:$0xff] %v1818_v47  ;;  %v1816_v57 = vadd.f32 %v3672_v41, %v1676_v19 }
 0x27a   : > { %1832 = vst [vmem:[%s2732_s22 + $0x8] sm:$0xff] %v1816_v57 }
 0x294   : > { %v2158_v61 = vpop.f32.mrf.mxu1 }
 0x295   : > { %v1697_v54 = vadd.f32 %v2158_v61, %v3699_v11 }
 0x296   : > { %v1688_v12 = vpop.f32.mrf.mxu1 }
 0x297   : > { %v1821_v9 = vadd.f32 %v1776_v38, %v1697_v54  ;;  %v1689_v1 = vadd.f32 %v3699_v11, %v1688_v12 }
 0x298   : > { %v2159_v51 = vpop.f32.mrf.mxu1 }
 0x299   : > { %1837 = vst [vmem:[%s2732_s22 + $0x30] sm:$0xff] %v1821_v9  ;;  %v1819_v27 = vadd.f32 %v1771_v39, %v1689_v1  ;;  %v1700_v32 = vadd.f32 %v2159_v51, %v3699_v11 }
 0x29a   : > { %v1691_v33 = vpop.f32.mrf.mxu1 }
 0x29b   : > { %1835 = vst [vmem:[%s2732_s22 + $0x20] sm:$0xff] %v1819_v27  ;;  %v1822_v13 = vadd.f32 %v1778_v25, %v1700_v32  ;;  %v1692_v41 = vadd.f32 %v3699_v11, %v1691_v33 }
 0x29d   : > { %1838 = vst [vmem:[%s2732_s22 + $0x38] sm:$0xff] %v1822_v13  ;;  %v1820_v60 = vadd.f32 %v3680_v3, %v1692_v41 }
 0x29f   : > { %1836 = vst [vmem:[%s2732_s22 + $0x28] sm:$0xff] %v1820_v60 }
 0x2b9   : > { %v2162_v38 = vpop.f32.mrf.mxu1 }
 0x2ba   : > { %v1713_v58 = vadd.f32 %v2162_v38, %v3699_v11 }
 0x2bb   : > { %v1704_v63 = vpop.f32.mrf.mxu1 }
 0x2bc   : > { %v1825_v10 = vadd.f32 %v1786_v14, %v1713_v58  ;;  %v1705_v39 = vadd.f32 %v3699_v11, %v1704_v63 }
 0x2bd   : > { %v2163_v18 = vpop.f32.mrf.mxu1 }
 0x2be   : > { %1841 = vst [vmem:[%s2732_s22 + $0x50] sm:$0xff] %v1825_v10  ;;  %v1823_v25 = vadd.f32 %v1781_v20, %v1705_v39  ;;  %v1716_v30 = vadd.f32 %v2163_v18, %v3699_v11 }
 0x2bf   : > { %v1707_v48 = vpop.f32.mrf.mxu1 }
 0x2c0   : > { %1839 = vst [vmem:[%s2732_s22 + $0x40] sm:$0xff] %v1823_v25  ;;  %v1826_v3 = vadd.f32 %v1788_v46, %v1716_v30  ;;  %v1708_v45 = vadd.f32 %v3699_v11, %v1707_v48 }
 0x2c2   : > { %1842 = vst [vmem:[%s2732_s22 + $0x58] sm:$0xff] %v1826_v3  ;;  %v1824_v59 = vadd.f32 %v3686_v56, %v1708_v45 }
 0x2c4   : > { %1840 = vst [vmem:[%s2732_s22 + $0x48] sm:$0xff] %v1824_v59 }
 0x2ce   : > { %v2166_v23 = vpop.f32.mrf.mxu1 }
 0x2cf   : > { %v1729_v26 = vadd.f32 %v2166_v23, %v3699_v11 }
 0x2d0   : > { %v1720_v2 = vpop.f32.mrf.mxu1 }
 0x2d1   : > { %v1829_v14 = vadd.f32 %v1796_v0, %v1729_v26  ;;  %v1721_v37 = vadd.f32 %v3699_v11, %v1720_v2 }
 0x2d2   : > { %v2167_v42 = vpop.f32.mrf.mxu1 }
 0x2d3   : > { %1845 = vst [vmem:[%s2732_s22 + $0x70] sm:$0xff] %v1829_v14  ;;  %v1827_v4 = vadd.f32 %v1791_v49, %v1721_v37  ;;  %v1732_v15 = vadd.f32 %v2167_v42, %v3699_v11 }
 0x2d4   : > { %v1723_v20 = vpop.f32.mrf.mxu1 }
 0x2d5   : > { %1843 = vst [vmem:[%s2732_s22 + $0x60] sm:$0xff] %v1827_v4  ;;  %v1830_v46 = vadd.f32 %v3691_v28, %v1732_v15  ;;  %v1724_v56 = vadd.f32 %v3699_v11, %v1723_v20 }
 0x2d7   : > { %1846 = vst [vmem:[%s2732_s22 + $0x78] sm:$0xff] %v1830_v46  ;;  %v1828_v62 = vadd.f32 %v3694_v34, %v1724_v56 }
 0x2d9   : > { %1844 = vst [vmem:[%s2732_s22 + $0x68] sm:$0xff] %v1828_v62 }
 0x2da   : > { %2451 = shalt.err (!%p2448_p9)
}
 0x2db   : > { %s2452_s30 = scalar_lea.hbm %s3748_s11, 2048  ;;  %s2456_s29 = scalar_lea.hbm %s3811_s7, 8192 }
 0x2dc   : > { %p2453_p11 = scmp.ne.s32.totalorder %s3748_s11, %s2452_s30  ;;  %p2457_p4 = scmp.lt.s32.totalorder %s3748_s11, %s3811_s7 }
 0x2dd   : > { %p2458_p5 = scmp.lt.s32.totalorder %s2456_s29, %s2452_s30 }
 0x2de   : > { %p2454_p13 = pnand %p2453_p11, %p2647_p3 }
 0x2df   : > { %p2459_p6 = por %p2458_p5, %p2457_p4 }
 0x2e0   : > { %p2455_p2 = pneg %p2454_p13 }
 0x2e2   : > { %p2460_p7 = pnand %p2459_p6, %p2455_p2 }
 0x2e4   : > { %2463 = shalt.err (!%p2460_p7)
}
 0x2e5   : > { %s2553_s10 = smov 128   ;;  %s2554_s13 = smov 8  }
 0x2e6   : > { %2196 = dma.vmem_to_hbm [thread:$0]  (%p2647_p3), %s3741_s17, 2048, %s3748_s11, %s3753_s20, %s2553_s10, %s2553_s10, %s2554_s13  }
 0x2e7 PF: > { %p2218_p10 = scmp.ge.s32.totalorder %s2540_s8, 2  ;;  %s1879_s14 = sand.u32 1, %s2512_s24  }
 0x2e8   : > { %s1880_s27 = scalar_lea.sflag [#allocation6], %s1879_s14 }
 0x2e9   : > { %p2209_p12 = pnand %p2218_p10, %p2656_p8 }
 0x2eb   : > { %p2210_p0 = pneg %p2209_p12 }
 0x2ed   : > { %2507 = dma.done.wait (%p2210_p0), %s1880_s27, 2048  }
 0x2ee   : > { %2509 = vsyncadd (%p2210_p0), %s1880_s27, 4294965248  ;;  %s22_s8 = sadd.s32 1, %s2540_s8   ;;  %s3970_s27 = sld [smem:[#allocation19_spill]] }
 0x2ef   : > { %p19_p1 = scmp.ge.s32.totalorder %s22_s8, 6   ;;  %s3971_s28 = sld [smem:[#allocation20_spill]] }
 0x2f0   : > { %s3972_s29 = sld [smem:[#allocation21_spill]]  ;;  %s3974_s24 = smov %s2516_s25 }
 0x2f1   : > { %s3973_s30 = sld [smem:[#allocation22_spill]]  ;;  %s3975_s25 = smov %s2520_s26 }
 0x2f2   : > { %s3976_s26 = smov %s2674_s21  ;;  %21 = sbr.rel (!%p19_p1) target bundleno = 11 (0xb), region = 94 }
 0x2f7   :  { %1885 = vsyncpa [#allocation5], 1 }
 0x2f8   :  { %1887 = vsyncpa [#allocation5 + $0x1], 1 }
 0x2f9   :  { %1888 = vsyncpa [#allocation8], 1 }
 0x2fa   :  { %1889 = vsyncpa [#allocation6], 1 }
 0x2fb   :  { %1891 = vsyncpa [#allocation6 + $0x1], 1 }
 0x2fc   :  { %1892 = vsyncmov [#allocation3] }
 0x2ff   :  { %s1893_s15 = vpop.sfrf %1892 }
 0x300   :  { %p2019_p3 = scmp.ne.s32.totalorder %s1893_s15, 0 }
 0x302   :  { %1897 = shalt.err (%p2019_p3)  }

</bundles_post_ra>
